<compile_context>
chip_gen: v7x
topology: tpu7x:2x2x1
jax: 0.10.0
libtpu: 0.0.40
codegen_flags: <defaults>
</compile_context>

<pallas_src>
import jax
import jax.numpy as jnp
import numpy as np
from jax import lax
from jax.experimental import pallas as pl
from jax.experimental.pallas import tpu as pltpu


# ------------------------------ fused kernel --------------------------------

def _lenet5_kernel(xr_ref, w1_ref, b1_ref, w2_ref, b2_ref,
                   wf1_ref, bf1_ref, wf2_ref, bf2_ref, wf3_ref, bf3_ref,
                   o_ref):
    f32 = jnp.float32
    tb = xr_ref.shape[2] // 24                    # samples in this batch tile

    b1 = b1_ref[...]                              # (1, 128)
    b2 = b2_ref[...]                              # (1, 128)

    # ---- conv1: 5 fused banded matmuls over the whole tile -----------------
    # xr row (per sample) g*6+q holds input row 4*q + g + ki for tap ki, so
    # row g*6+q of sum_ki xr[ki] @ W1[ki] is conv1 output row 4*q+g with the
    # even / odd output columns fused into lanes [0:72] / [128:200].
    acc1 = jnp.dot(xr_ref[0, 0], w1_ref[0], preferred_element_type=f32)
    for ki in range(1, 5):
        acc1 = acc1 + jnp.dot(xr_ref[0, ki], w1_ref[ki],
                              preferred_element_type=f32)     # (tb*24, 256)
    pm1 = jnp.maximum(acc1[:, :128], acc1[:, 128:])            # width half of pool

    # height half of the pool + bias + relu, all in registers.  Per sample:
    # rows [0:6]=out rows 4q, [6:12]=4q+1, [12:18]=4q+2, [18:24]=4q+3.
    h1e, h1o = [], []     # pooled conv1 rows ip=2q / ip=2q+1, per sample
    for b in range(tb):
        s = b * 24
        h1e.append(jnp.maximum(
            jnp.maximum(pm1[s:s + 6], pm1[s + 6:s + 12]) + b1, 0.0))
        h1o.append(jnp.maximum(
            jnp.maximum(pm1[s + 12:s + 18], pm1[s + 18:s + 24]) + b1, 0.0))

    # ---- conv2: 5 fused banded matmuls over the whole tile -----------------
    # For tap ki, pooled-row group d in {0,1} needs pooled-conv1 rows
    # 2*ip2 + d + ki (ip2 = 0..3) == a contiguous 4-row slice of h1e / h1o.
    acc2 = None
    for ki in range(5):
        rows = []
        for b in range(tb):
            parts = (h1e[b], h1o[b])
            rows.append(parts[ki % 2][ki // 2: ki // 2 + 4])
            rows.append(parts[(ki + 1) % 2][(ki + 1) // 2: (ki + 1) // 2 + 4])
        mk = jnp.concatenate(rows, axis=0)                     # (tb*8, 128)
        d = jnp.dot(mk, w2_ref[ki], preferred_element_type=f32)  # (tb*8, 256)
        acc2 = d if acc2 is None else acc2 + d
    pm2 = jnp.maximum(acc2[:, :128], acc2[:, 128:])            # width half of pool

    # per sample: rows [b*8 : b*8+4] = conv2 out rows 2*ip2, next 4 = 2*ip2+1
    h2p = []
    for b in range(tb):
        s = b * 8
        h2p.append(jnp.maximum(
            jnp.maximum(pm2[s:s + 4], pm2[s + 4:s + 8]) + b2, 0.0))  # (4, 128)

    # ---- fc1 / fc2 / fc3, batched across the tile ---------------------------
    # torch's NCHW flatten is folded into wf1's per-row-block layout.
    f1 = bf1_ref[...]                                          # (1, 128)
    for r in range(4):
        hr = jnp.concatenate([h2p[b][r:r + 1, :] for b in range(tb)], axis=0)
        f1 = f1 + jnp.dot(hr, wf1_ref[r], preferred_element_type=f32)
    f1 = jnp.maximum(f1, 0.0)                                  # (tb, 128)
    f2 = jnp.maximum(
        jnp.dot(f1, wf2_ref[...], preferred_element_type=f32) + bf2_ref[...],
        0.0)
    f3 = jnp.dot(f2, wf3_ref[...], preferred_element_type=f32) + bf3_ref[...]
    o_ref[...] = f3                                            # one (tb,128) store


# ------------------------------- wrapper ------------------------------------

def lenet5_forward(x, kparams, num_classes=10):
    """x: (B, 1, 28, 28) float32; kparams: output of prepare_params()."""
    assert x.shape[1:] == (1, 28, 28), "LeNet5 fc1 pins the input to 1x28x28"
    batch = x.shape[0]
    xs = x.reshape(batch, 28, 28).astype(jnp.float32)

    # Batch tile size; grid over batch tiles (parallel across TCs on v7x).
    tb = batch if batch <= 8 else 8
    b_pad = ((batch + tb - 1) // tb) * tb
    if b_pad != batch:
        xs = jnp.concatenate(
            [xs, jnp.zeros((b_pad - batch, 28, 28), xs.dtype)], axis=0)
    n_tiles = b_pad // tb

    # rows-only im2col with pool-friendly ordering (done in XLA, tiny data):
    #   x_rows[b, ki, g*6 + q, :] = x[b, 4*q + g + ki, :]
    ki_a = np.arange(5)[:, None, None]
    g_a = np.arange(4)[None, :, None]
    q_a = np.arange(6)[None, None, :]
    row_idx = (4 * q_a + g_a + ki_a).reshape(5, 24)            # values in 0..27
    xr = xs[:, row_idx, :]                                     # (b_pad, 5, 24, 28)
    # fold the batch tile into the matmul M dimension:
    xr = xr.reshape(n_tiles, tb, 5, 24, 28).transpose(0, 2, 1, 3, 4)
    xr = xr.reshape(n_tiles, 5, tb * 24, 28)

    def _const_spec(shape):
        zeros = (0,) * len(shape)
        return pl.BlockSpec(shape, lambda i, _z=zeros: _z)

    weights = [kparams["w1"], kparams["b1"], kparams["w2"], kparams["b2"],
               kparams["wf1"], kparams["bf1"], kparams["wf2"], kparams["bf2"],
               kparams["wf3"], kparams["bf3"]]

    out_pad = pl.pallas_call(
        _lenet5_kernel,
        out_shape=jax.ShapeDtypeStruct((b_pad, 128), jnp.float32),
        grid=(n_tiles,),
        in_specs=[pl.BlockSpec((1, 5, tb * 24, 28), lambda i: (i, 0, 0, 0))]
                 + [_const_spec(w.shape) for w in weights],
        out_specs=pl.BlockSpec((tb, 128), lambda i: (i, 0)),
        compiler_params=pltpu.CompilerParams(
            dimension_semantics=("parallel",)),
    )(xr, *weights)
    return out_pad[:batch, :num_classes]


# --------------------- parameter preparation (one-time) ---------------------

def prepare_params(params):
    """Convert torch-layout LeNet5 params into the kernel's fused banded layout."""
    w1 = np.asarray(params["w_conv1"], np.float32)    # (6, 1, 5, 5)
    b1 = np.asarray(params["b_conv1"], np.float32)    # (6,)
    w2 = np.asarray(params["w_conv2"], np.float32)    # (16, 6, 5, 5)
    b2 = np.asarray(params["b_conv2"], np.float32)    # (16,)
    wf1 = np.asarray(params["w_fc1"], np.float32)     # (120, 256)  torch (out, in)
    bf1 = np.asarray(params["b_fc1"], np.float32)
    wf2 = np.asarray(params["w_fc2"], np.float32)     # (84, 120)
    bf2 = np.asarray(params["b_fc2"], np.float32)
    wf3 = np.asarray(params["w_fc3"], np.float32)     # (nc, 84)
    bf3 = np.asarray(params["b_fc3"], np.float32)
    nc = wf3.shape[0]
    assert nc <= 128

    # conv1 band weights, even/odd output-column phases fused into 256 lanes:
    #   w1k[ki, j + kj, (j%2)*128 + (j//2)*6 + oc] = w1[oc, 0, ki, kj]
    w1k = np.zeros((5, 28, 256), np.float32)
    for ki in range(5):
        for j in range(24):
            base = (j % 2) * 128 + (j // 2) * 6
            for kj in range(5):
                w1k[ki, j + kj, base:base + 6] = w1[:, 0, ki, kj]
    b1r = np.zeros((1, 128), np.float32)
    b1r[0, :72] = np.tile(b1, 12)

    # conv2 band weights over the pooled conv1 map (rows = jp*6 + c, padded to
    # 128); output columns = (j2%2)*128 + (j2//2)*16 + oc2.
    w2k = np.zeros((5, 128, 256), np.float32)
    for ki in range(5):
        for j2 in range(8):
            base = (j2 % 2) * 128 + (j2 // 2) * 16
            for kj in range(5):
                for c in range(6):
                    w2k[ki, (j2 + kj) * 6 + c, base:base + 16] = w2[:, c, ki, kj]
    b2r = np.zeros((1, 128), np.float32)
    b2r[0, :64] = np.tile(b2, 4)

    # fc1: layout (4, 128, 128) = [ip2, jp2*16 + oc2 (padded), n (padded)];
    # the torch NCHW flatten index f = oc2*16 + ip2*4 + jp2 is folded in.
    wf1k = np.zeros((4, 128, 128), np.float32)
    for r in range(4):
        for jp2 in range(4):
            for oc2 in range(16):
                f = oc2 * 16 + r * 4 + jp2
                wf1k[r, jp2 * 16 + oc2, :120] = wf1[:, f]
    bf1k = np.zeros((1, 128), np.float32)
    bf1k[0, :120] = bf1

    wf2k = np.zeros((128, 128), np.float32)
    wf2k[:120, :84] = wf2.T
    bf2k = np.zeros((1, 128), np.float32)
    bf2k[0, :84] = bf2

    wf3k = np.zeros((128, 128), np.float32)
    wf3k[:84, :nc] = wf3.T
    bf3k = np.zeros((1, 128), np.float32)
    bf3k[0, :nc] = bf3

    host = dict(w1=w1k, b1=b1r, w2=w2k, b2=b2r,
                wf1=wf1k, bf1=bf1k, wf2=wf2k, bf2=bf2k, wf3=wf3k, bf3=bf3k)
    return {k: jnp.asarray(v) for k, v in host.items()}


# -------------------------- torch-layout parameters --------------------------

def init_params(key, num_classes=10):
    # Deterministic, torch-default-style uniform(-1/sqrt(fan_in), 1/sqrt(fan_in)).
    ks = jax.random.split(key, 10)

    def u(k, shape, fan_in):
        bound = 1.0 / float(fan_in) ** 0.5
        return jax.random.uniform(k, shape, jnp.float32, -bound, bound)

    return {
        "w_conv1": u(ks[0], (6, 1, 5, 5), 1 * 5 * 5),
        "b_conv1": u(ks[1], (6,), 1 * 5 * 5),
        "w_conv2": u(ks[2], (16, 6, 5, 5), 6 * 5 * 5),
        "b_conv2": u(ks[3], (16,), 6 * 5 * 5),
        "w_fc1": u(ks[4], (120, 16 * 4 * 4), 16 * 4 * 4),   # torch (out, in)
        "b_fc1": u(ks[5], (120,), 16 * 4 * 4),
        "w_fc2": u(ks[6], (84, 120), 120),
        "b_fc2": u(ks[7], (84,), 120),
        "w_fc3": u(ks[8], (num_classes, 84), 84),
        "b_fc3": u(ks[9], (num_classes,), 84),
    }


# ------------------------- plain-JAX reference check -------------------------

def reference_forward(x, p):
    hp = lax.Precision.HIGHEST
    y = lax.conv_general_dilated(x, p["w_conv1"], (1, 1), "VALID",
                                 dimension_numbers=("NCHW", "OIHW", "NCHW"),
                                 precision=hp)
    y = jnp.maximum(y + p["b_conv1"][None, :, None, None], 0.0)
    y = lax.reduce_window(y, -jnp.inf, lax.max, (1, 1, 2, 2), (1, 1, 2, 2), "VALID")
    y = lax.conv_general_dilated(y, p["w_conv2"], (1, 1), "VALID",
                                 dimension_numbers=("NCHW", "OIHW", "NCHW"),
                                 precision=hp)
    y = jnp.maximum(y + p["b_conv2"][None, :, None, None], 0.0)
    y = lax.reduce_window(y, -jnp.inf, lax.max, (1, 1, 2, 2), (1, 1, 2, 2), "VALID")
    y = y.reshape(y.shape[0], -1)                      # NCHW flatten == torch .view
    y = jnp.maximum(jnp.dot(y, p["w_fc1"].T, precision=hp) + p["b_fc1"], 0.0)
    y = jnp.maximum(jnp.dot(y, p["w_fc2"].T, precision=hp) + p["b_fc2"], 0.0)
    return jnp.dot(y, p["w_fc3"].T, precision=hp) + p["b_fc3"]


if __name__ == "__main__":
    key = jax.random.PRNGKey(0)
    pkey, xkey = jax.random.split(key)
    params = init_params(pkey)          # torch-layout params
    kparams = prepare_params(params)    # kernel-layout params (one-time)
    # fc1 expects 16*4*4 features, which pins the input spatial size to 28x28.
    x = jax.random.normal(xkey, (2, 1, 28, 28), jnp.float32)

    out = jax.jit(lenet5_forward)(x, kparams)
    jax.block_until_ready(out)
    assert out.shape == (2, 10) and out.dtype == jnp.float32

    ref = reference_forward(x, params)
    if not bool(jnp.allclose(out, ref, rtol=1e-3, atol=1e-3)):
        raise AssertionError(
            "kernel/reference mismatch, max abs err = "
            f"{float(jnp.max(jnp.abs(out - ref)))}")
    print("KERNEL_OK")
</pallas_src>

<mosaic_0001>
module attributes {stable_mosaic.version = 11 : i64} {
  func.func @_lenet5_kernel(%arg0: i32, %arg1: memref<1x5x48x28xf32, #tpu.memory_space<vmem>>, %arg2: memref<5x28x256xf32, #tpu.memory_space<vmem>>, %arg3: memref<1x128xf32, #tpu.memory_space<vmem>>, %arg4: memref<5x128x256xf32, #tpu.memory_space<vmem>>, %arg5: memref<1x128xf32, #tpu.memory_space<vmem>>, %arg6: memref<4x128x128xf32, #tpu.memory_space<vmem>>, %arg7: memref<1x128xf32, #tpu.memory_space<vmem>>, %arg8: memref<128x128xf32, #tpu.memory_space<vmem>>, %arg9: memref<1x128xf32, #tpu.memory_space<vmem>>, %arg10: memref<128x128xf32, #tpu.memory_space<vmem>>, %arg11: memref<1x128xf32, #tpu.memory_space<vmem>>, %arg12: memref<2x128xf32, #tpu.memory_space<vmem>>) attributes {dimension_semantics = [#tpu.dimension_semantics<parallel>], iteration_bounds = array<i64: 1>, scalar_prefetch = 0 : i64, scratch_operands = 0 : i64, tpu.core_type = #tpu.core_type<tc>, window_params = [{transform_indices = @transform_0, window_bounds = array<i64: 1, 5, 48, 28>}, {pipeline_mode = #tpu.pipeline_mode<synchronous>, transform_indices = @transform_1, window_bounds = array<i64: 5, 28, 256>}, {pipeline_mode = #tpu.pipeline_mode<synchronous>, transform_indices = @transform_2, window_bounds = array<i64: 1, 128>}, {pipeline_mode = #tpu.pipeline_mode<synchronous>, transform_indices = @transform_3, window_bounds = array<i64: 5, 128, 256>}, {pipeline_mode = #tpu.pipeline_mode<synchronous>, transform_indices = @transform_4, window_bounds = array<i64: 1, 128>}, {pipeline_mode = #tpu.pipeline_mode<synchronous>, transform_indices = @transform_5, window_bounds = array<i64: 4, 128, 128>}, {pipeline_mode = #tpu.pipeline_mode<synchronous>, transform_indices = @transform_6, window_bounds = array<i64: 1, 128>}, {pipeline_mode = #tpu.pipeline_mode<synchronous>, transform_indices = @transform_7, window_bounds = array<i64: 128, 128>}, {pipeline_mode = #tpu.pipeline_mode<synchronous>, transform_indices = @transform_8, window_bounds = array<i64: 1, 128>}, {pipeline_mode = #tpu.pipeline_mode<synchronous>, transform_indices = @transform_9, window_bounds = array<i64: 128, 128>}, {pipeline_mode = #tpu.pipeline_mode<synchronous>, transform_indices = @transform_10, window_bounds = array<i64: 1, 128>}, {transform_indices = @transform_11, window_bounds = array<i64: 2, 128>}]} {
    %c0 = arith.constant 0 : index
    %c0_0 = arith.constant 0 : index
    %0 = vector.load %arg3[%c0, %c0_0] : memref<1x128xf32, #tpu.memory_space<vmem>>, vector<1x128xf32>
    %c0_1 = arith.constant 0 : index
    %c0_2 = arith.constant 0 : index
    %1 = vector.load %arg5[%c0_1, %c0_2] : memref<1x128xf32, #tpu.memory_space<vmem>>, vector<1x128xf32>
    %c0_3 = arith.constant 0 : index
    %c0_4 = arith.constant 0 : index
    %c0_5 = arith.constant 0 : index
    %c0_6 = arith.constant 0 : index
    %2 = vector.load %arg1[%c0_3, %c0_4, %c0_5, %c0_6] : memref<1x5x48x28xf32, #tpu.memory_space<vmem>>, vector<1x1x48x28xf32>
    %3 = vector.shape_cast %2 : vector<1x1x48x28xf32> to vector<48x28xf32>
    %c0_7 = arith.constant 0 : index
    %c0_8 = arith.constant 0 : index
    %c0_9 = arith.constant 0 : index
    %4 = vector.load %arg2[%c0_7, %c0_8, %c0_9] : memref<5x28x256xf32, #tpu.memory_space<vmem>>, vector<1x28x256xf32>
    %5 = vector.shape_cast %4 : vector<1x28x256xf32> to vector<28x256xf32>
    %cst = arith.constant dense<0.000000e+00> : vector<48x256xf32>
    %6 = tpu.matmul %3, %5, %cst {dimension_numbers = #tpu.dot_dimension_numbers<[1], [0], [0], [1], [0, 0, 1, 1], [], []>} : vector<48x28xf32>, vector<28x256xf32>, vector<48x256xf32> -> vector<48x256xf32>
    %c0_10 = arith.constant 0 : index
    %c1 = arith.constant 1 : index
    %c0_11 = arith.constant 0 : index
    %c0_12 = arith.constant 0 : index
    %7 = vector.load %arg1[%c0_10, %c1, %c0_11, %c0_12] : memref<1x5x48x28xf32, #tpu.memory_space<vmem>>, vector<1x1x48x28xf32>
    %8 = vector.shape_cast %7 : vector<1x1x48x28xf32> to vector<48x28xf32>
    %c1_13 = arith.constant 1 : index
    %c0_14 = arith.constant 0 : index
    %c0_15 = arith.constant 0 : index
    %9 = vector.load %arg2[%c1_13, %c0_14, %c0_15] : memref<5x28x256xf32, #tpu.memory_space<vmem>>, vector<1x28x256xf32>
    %10 = vector.shape_cast %9 : vector<1x28x256xf32> to vector<28x256xf32>
    %cst_16 = arith.constant dense<0.000000e+00> : vector<48x256xf32>
    %11 = tpu.matmul %8, %10, %cst_16 {dimension_numbers = #tpu.dot_dimension_numbers<[1], [0], [0], [1], [0, 0, 1, 1], [], []>} : vector<48x28xf32>, vector<28x256xf32>, vector<48x256xf32> -> vector<48x256xf32>
    %12 = arith.addf %6, %11 : vector<48x256xf32>
    %c0_17 = arith.constant 0 : index
    %c2 = arith.constant 2 : index
    %c0_18 = arith.constant 0 : index
    %c0_19 = arith.constant 0 : index
    %13 = vector.load %arg1[%c0_17, %c2, %c0_18, %c0_19] : memref<1x5x48x28xf32, #tpu.memory_space<vmem>>, vector<1x1x48x28xf32>
    %14 = vector.shape_cast %13 : vector<1x1x48x28xf32> to vector<48x28xf32>
    %c2_20 = arith.constant 2 : index
    %c0_21 = arith.constant 0 : index
    %c0_22 = arith.constant 0 : index
    %15 = vector.load %arg2[%c2_20, %c0_21, %c0_22] : memref<5x28x256xf32, #tpu.memory_space<vmem>>, vector<1x28x256xf32>
    %16 = vector.shape_cast %15 : vector<1x28x256xf32> to vector<28x256xf32>
    %cst_23 = arith.constant dense<0.000000e+00> : vector<48x256xf32>
    %17 = tpu.matmul %14, %16, %cst_23 {dimension_numbers = #tpu.dot_dimension_numbers<[1], [0], [0], [1], [0, 0, 1, 1], [], []>} : vector<48x28xf32>, vector<28x256xf32>, vector<48x256xf32> -> vector<48x256xf32>
    %18 = arith.addf %12, %17 : vector<48x256xf32>
    %c0_24 = arith.constant 0 : index
    %c3 = arith.constant 3 : index
    %c0_25 = arith.constant 0 : index
    %c0_26 = arith.constant 0 : index
    %19 = vector.load %arg1[%c0_24, %c3, %c0_25, %c0_26] : memref<1x5x48x28xf32, #tpu.memory_space<vmem>>, vector<1x1x48x28xf32>
    %20 = vector.shape_cast %19 : vector<1x1x48x28xf32> to vector<48x28xf32>
    %c3_27 = arith.constant 3 : index
    %c0_28 = arith.constant 0 : index
    %c0_29 = arith.constant 0 : index
    %21 = vector.load %arg2[%c3_27, %c0_28, %c0_29] : memref<5x28x256xf32, #tpu.memory_space<vmem>>, vector<1x28x256xf32>
    %22 = vector.shape_cast %21 : vector<1x28x256xf32> to vector<28x256xf32>
    %cst_30 = arith.constant dense<0.000000e+00> : vector<48x256xf32>
    %23 = tpu.matmul %20, %22, %cst_30 {dimension_numbers = #tpu.dot_dimension_numbers<[1], [0], [0], [1], [0, 0, 1, 1], [], []>} : vector<48x28xf32>, vector<28x256xf32>, vector<48x256xf32> -> vector<48x256xf32>
    %24 = arith.addf %18, %23 : vector<48x256xf32>
    %c0_31 = arith.constant 0 : index
    %c4 = arith.constant 4 : index
    %c0_32 = arith.constant 0 : index
    %c0_33 = arith.constant 0 : index
    %25 = vector.load %arg1[%c0_31, %c4, %c0_32, %c0_33] : memref<1x5x48x28xf32, #tpu.memory_space<vmem>>, vector<1x1x48x28xf32>
    %26 = vector.shape_cast %25 : vector<1x1x48x28xf32> to vector<48x28xf32>
    %c4_34 = arith.constant 4 : index
    %c0_35 = arith.constant 0 : index
    %c0_36 = arith.constant 0 : index
    %27 = vector.load %arg2[%c4_34, %c0_35, %c0_36] : memref<5x28x256xf32, #tpu.memory_space<vmem>>, vector<1x28x256xf32>
    %28 = vector.shape_cast %27 : vector<1x28x256xf32> to vector<28x256xf32>
    %cst_37 = arith.constant dense<0.000000e+00> : vector<48x256xf32>
    %29 = tpu.matmul %26, %28, %cst_37 {dimension_numbers = #tpu.dot_dimension_numbers<[1], [0], [0], [1], [0, 0, 1, 1], [], []>} : vector<48x28xf32>, vector<28x256xf32>, vector<48x256xf32> -> vector<48x256xf32>
    %30 = arith.addf %24, %29 : vector<48x256xf32>
    %31 = vector.extract_strided_slice %30 {offsets = [0, 0], sizes = [48, 128], strides = [1, 1]} : vector<48x256xf32> to vector<48x128xf32>
    %32 = vector.extract_strided_slice %30 {offsets = [0, 128], sizes = [48, 128], strides = [1, 1]} : vector<48x256xf32> to vector<48x128xf32>
    %33 = arith.maximumf %31, %32 : vector<48x128xf32>
    %34 = vector.extract_strided_slice %33 {offsets = [0, 0], sizes = [6, 128], strides = [1, 1]} : vector<48x128xf32> to vector<6x128xf32>
    %35 = vector.extract_strided_slice %33 {offsets = [6, 0], sizes = [6, 128], strides = [1, 1]} : vector<48x128xf32> to vector<6x128xf32>
    %36 = arith.maximumf %34, %35 : vector<6x128xf32>
    %37 = vector.broadcast %0 : vector<1x128xf32> to vector<6x128xf32>
    %38 = arith.addf %36, %37 : vector<6x128xf32>
    %cst_38 = arith.constant 0.000000e+00 : f32
    %39 = vector.broadcast %cst_38 : f32 to vector<6x128xf32>
    %40 = arith.maximumf %38, %39 : vector<6x128xf32>
    %41 = vector.extract_strided_slice %33 {offsets = [12, 0], sizes = [6, 128], strides = [1, 1]} : vector<48x128xf32> to vector<6x128xf32>
    %42 = vector.extract_strided_slice %33 {offsets = [18, 0], sizes = [6, 128], strides = [1, 1]} : vector<48x128xf32> to vector<6x128xf32>
    %43 = arith.maximumf %41, %42 : vector<6x128xf32>
    %44 = vector.broadcast %0 : vector<1x128xf32> to vector<6x128xf32>
    %45 = arith.addf %43, %44 : vector<6x128xf32>
    %cst_39 = arith.constant 0.000000e+00 : f32
    %46 = vector.broadcast %cst_39 : f32 to vector<6x128xf32>
    %47 = arith.maximumf %45, %46 : vector<6x128xf32>
    %48 = vector.extract_strided_slice %33 {offsets = [24, 0], sizes = [6, 128], strides = [1, 1]} : vector<48x128xf32> to vector<6x128xf32>
    %49 = vector.extract_strided_slice %33 {offsets = [30, 0], sizes = [6, 128], strides = [1, 1]} : vector<48x128xf32> to vector<6x128xf32>
    %50 = arith.maximumf %48, %49 : vector<6x128xf32>
    %51 = vector.broadcast %0 : vector<1x128xf32> to vector<6x128xf32>
    %52 = arith.addf %50, %51 : vector<6x128xf32>
    %cst_40 = arith.constant 0.000000e+00 : f32
    %53 = vector.broadcast %cst_40 : f32 to vector<6x128xf32>
    %54 = arith.maximumf %52, %53 : vector<6x128xf32>
    %55 = vector.extract_strided_slice %33 {offsets = [36, 0], sizes = [6, 128], strides = [1, 1]} : vector<48x128xf32> to vector<6x128xf32>
    %56 = vector.extract_strided_slice %33 {offsets = [42, 0], sizes = [6, 128], strides = [1, 1]} : vector<48x128xf32> to vector<6x128xf32>
    %57 = arith.maximumf %55, %56 : vector<6x128xf32>
    %58 = vector.broadcast %0 : vector<1x128xf32> to vector<6x128xf32>
    %59 = arith.addf %57, %58 : vector<6x128xf32>
    %cst_41 = arith.constant 0.000000e+00 : f32
    %60 = vector.broadcast %cst_41 : f32 to vector<6x128xf32>
    %61 = arith.maximumf %59, %60 : vector<6x128xf32>
    %62 = vector.extract_strided_slice %40 {offsets = [0, 0], sizes = [4, 128], strides = [1, 1]} : vector<6x128xf32> to vector<4x128xf32>
    %63 = vector.extract_strided_slice %47 {offsets = [0, 0], sizes = [4, 128], strides = [1, 1]} : vector<6x128xf32> to vector<4x128xf32>
    %64 = vector.extract_strided_slice %54 {offsets = [0, 0], sizes = [4, 128], strides = [1, 1]} : vector<6x128xf32> to vector<4x128xf32>
    %65 = vector.extract_strided_slice %61 {offsets = [0, 0], sizes = [4, 128], strides = [1, 1]} : vector<6x128xf32> to vector<4x128xf32>
    %66 = tpu.concatenate %62, %63, %64, %65 in 0 : vector<4x128xf32>, vector<4x128xf32>, vector<4x128xf32>, vector<4x128xf32> -> vector<16x128xf32>
    %c0_42 = arith.constant 0 : index
    %c0_43 = arith.constant 0 : index
    %c0_44 = arith.constant 0 : index
    %67 = vector.load %arg4[%c0_42, %c0_43, %c0_44] : memref<5x128x256xf32, #tpu.memory_space<vmem>>, vector<1x128x256xf32>
    %68 = vector.shape_cast %67 : vector<1x128x256xf32> to vector<128x256xf32>
    %cst_45 = arith.constant dense<0.000000e+00> : vector<16x256xf32>
    %69 = tpu.matmul %66, %68, %cst_45 {dimension_numbers = #tpu.dot_dimension_numbers<[1], [0], [0], [1], [0, 0, 1, 1], [], []>} : vector<16x128xf32>, vector<128x256xf32>, vector<16x256xf32> -> vector<16x256xf32>
    %70 = vector.extract_strided_slice %47 {offsets = [0, 0], sizes = [4, 128], strides = [1, 1]} : vector<6x128xf32> to vector<4x128xf32>
    %71 = vector.extract_strided_slice %40 {offsets = [1, 0], sizes = [4, 128], strides = [1, 1]} : vector<6x128xf32> to vector<4x128xf32>
    %72 = vector.extract_strided_slice %61 {offsets = [0, 0], sizes = [4, 128], strides = [1, 1]} : vector<6x128xf32> to vector<4x128xf32>
    %73 = vector.extract_strided_slice %54 {offsets = [1, 0], sizes = [4, 128], strides = [1, 1]} : vector<6x128xf32> to vector<4x128xf32>
    %74 = tpu.concatenate %70, %71, %72, %73 in 0 : vector<4x128xf32>, vector<4x128xf32>, vector<4x128xf32>, vector<4x128xf32> -> vector<16x128xf32>
    %c1_46 = arith.constant 1 : index
    %c0_47 = arith.constant 0 : index
    %c0_48 = arith.constant 0 : index
    %75 = vector.load %arg4[%c1_46, %c0_47, %c0_48] : memref<5x128x256xf32, #tpu.memory_space<vmem>>, vector<1x128x256xf32>
    %76 = vector.shape_cast %75 : vector<1x128x256xf32> to vector<128x256xf32>
    %cst_49 = arith.constant dense<0.000000e+00> : vector<16x256xf32>
    %77 = tpu.matmul %74, %76, %cst_49 {dimension_numbers = #tpu.dot_dimension_numbers<[1], [0], [0], [1], [0, 0, 1, 1], [], []>} : vector<16x128xf32>, vector<128x256xf32>, vector<16x256xf32> -> vector<16x256xf32>
    %78 = arith.addf %69, %77 : vector<16x256xf32>
    %79 = vector.extract_strided_slice %40 {offsets = [1, 0], sizes = [4, 128], strides = [1, 1]} : vector<6x128xf32> to vector<4x128xf32>
    %80 = vector.extract_strided_slice %47 {offsets = [1, 0], sizes = [4, 128], strides = [1, 1]} : vector<6x128xf32> to vector<4x128xf32>
    %81 = vector.extract_strided_slice %54 {offsets = [1, 0], sizes = [4, 128], strides = [1, 1]} : vector<6x128xf32> to vector<4x128xf32>
    %82 = vector.extract_strided_slice %61 {offsets = [1, 0], sizes = [4, 128], strides = [1, 1]} : vector<6x128xf32> to vector<4x128xf32>
    %83 = tpu.concatenate %79, %80, %81, %82 in 0 : vector<4x128xf32>, vector<4x128xf32>, vector<4x128xf32>, vector<4x128xf32> -> vector<16x128xf32>
    %c2_50 = arith.constant 2 : index
    %c0_51 = arith.constant 0 : index
    %c0_52 = arith.constant 0 : index
    %84 = vector.load %arg4[%c2_50, %c0_51, %c0_52] : memref<5x128x256xf32, #tpu.memory_space<vmem>>, vector<1x128x256xf32>
    %85 = vector.shape_cast %84 : vector<1x128x256xf32> to vector<128x256xf32>
    %cst_53 = arith.constant dense<0.000000e+00> : vector<16x256xf32>
    %86 = tpu.matmul %83, %85, %cst_53 {dimension_numbers = #tpu.dot_dimension_numbers<[1], [0], [0], [1], [0, 0, 1, 1], [], []>} : vector<16x128xf32>, vector<128x256xf32>, vector<16x256xf32> -> vector<16x256xf32>
    %87 = arith.addf %78, %86 : vector<16x256xf32>
    %88 = vector.extract_strided_slice %47 {offsets = [1, 0], sizes = [4, 128], strides = [1, 1]} : vector<6x128xf32> to vector<4x128xf32>
    %89 = vector.extract_strided_slice %40 {offsets = [2, 0], sizes = [4, 128], strides = [1, 1]} : vector<6x128xf32> to vector<4x128xf32>
    %90 = vector.extract_strided_slice %61 {offsets = [1, 0], sizes = [4, 128], strides = [1, 1]} : vector<6x128xf32> to vector<4x128xf32>
    %91 = vector.extract_strided_slice %54 {offsets = [2, 0], sizes = [4, 128], strides = [1, 1]} : vector<6x128xf32> to vector<4x128xf32>
    %92 = tpu.concatenate %88, %89, %90, %91 in 0 : vector<4x128xf32>, vector<4x128xf32>, vector<4x128xf32>, vector<4x128xf32> -> vector<16x128xf32>
    %c3_54 = arith.constant 3 : index
    %c0_55 = arith.constant 0 : index
    %c0_56 = arith.constant 0 : index
    %93 = vector.load %arg4[%c3_54, %c0_55, %c0_56] : memref<5x128x256xf32, #tpu.memory_space<vmem>>, vector<1x128x256xf32>
    %94 = vector.shape_cast %93 : vector<1x128x256xf32> to vector<128x256xf32>
    %cst_57 = arith.constant dense<0.000000e+00> : vector<16x256xf32>
    %95 = tpu.matmul %92, %94, %cst_57 {dimension_numbers = #tpu.dot_dimension_numbers<[1], [0], [0], [1], [0, 0, 1, 1], [], []>} : vector<16x128xf32>, vector<128x256xf32>, vector<16x256xf32> -> vector<16x256xf32>
    %96 = arith.addf %87, %95 : vector<16x256xf32>
    %97 = vector.extract_strided_slice %40 {offsets = [2, 0], sizes = [4, 128], strides = [1, 1]} : vector<6x128xf32> to vector<4x128xf32>
    %98 = vector.extract_strided_slice %47 {offsets = [2, 0], sizes = [4, 128], strides = [1, 1]} : vector<6x128xf32> to vector<4x128xf32>
    %99 = vector.extract_strided_slice %54 {offsets = [2, 0], sizes = [4, 128], strides = [1, 1]} : vector<6x128xf32> to vector<4x128xf32>
    %100 = vector.extract_strided_slice %61 {offsets = [2, 0], sizes = [4, 128], strides = [1, 1]} : vector<6x128xf32> to vector<4x128xf32>
    %101 = tpu.concatenate %97, %98, %99, %100 in 0 : vector<4x128xf32>, vector<4x128xf32>, vector<4x128xf32>, vector<4x128xf32> -> vector<16x128xf32>
    %c4_58 = arith.constant 4 : index
    %c0_59 = arith.constant 0 : index
    %c0_60 = arith.constant 0 : index
    %102 = vector.load %arg4[%c4_58, %c0_59, %c0_60] : memref<5x128x256xf32, #tpu.memory_space<vmem>>, vector<1x128x256xf32>
    %103 = vector.shape_cast %102 : vector<1x128x256xf32> to vector<128x256xf32>
    %cst_61 = arith.constant dense<0.000000e+00> : vector<16x256xf32>
    %104 = tpu.matmul %101, %103, %cst_61 {dimension_numbers = #tpu.dot_dimension_numbers<[1], [0], [0], [1], [0, 0, 1, 1], [], []>} : vector<16x128xf32>, vector<128x256xf32>, vector<16x256xf32> -> vector<16x256xf32>
    %105 = arith.addf %96, %104 : vector<16x256xf32>
    %106 = vector.extract_strided_slice %105 {offsets = [0, 0], sizes = [16, 128], strides = [1, 1]} : vector<16x256xf32> to vector<16x128xf32>
    %107 = vector.extract_strided_slice %105 {offsets = [0, 128], sizes = [16, 128], strides = [1, 1]} : vector<16x256xf32> to vector<16x128xf32>
    %108 = arith.maximumf %106, %107 : vector<16x128xf32>
    %109 = vector.extract_strided_slice %108 {offsets = [0, 0], sizes = [4, 128], strides = [1, 1]} : vector<16x128xf32> to vector<4x128xf32>
    %110 = vector.extract_strided_slice %108 {offsets = [4, 0], sizes = [4, 128], strides = [1, 1]} : vector<16x128xf32> to vector<4x128xf32>
    %111 = arith.maximumf %109, %110 : vector<4x128xf32>
    %112 = vector.broadcast %1 : vector<1x128xf32> to vector<4x128xf32>
    %113 = arith.addf %111, %112 : vector<4x128xf32>
    %cst_62 = arith.constant 0.000000e+00 : f32
    %114 = vector.broadcast %cst_62 : f32 to vector<4x128xf32>
    %115 = arith.maximumf %113, %114 : vector<4x128xf32>
    %116 = vector.extract_strided_slice %108 {offsets = [8, 0], sizes = [4, 128], strides = [1, 1]} : vector<16x128xf32> to vector<4x128xf32>
    %117 = vector.extract_strided_slice %108 {offsets = [12, 0], sizes = [4, 128], strides = [1, 1]} : vector<16x128xf32> to vector<4x128xf32>
    %118 = arith.maximumf %116, %117 : vector<4x128xf32>
    %119 = vector.broadcast %1 : vector<1x128xf32> to vector<4x128xf32>
    %120 = arith.addf %118, %119 : vector<4x128xf32>
    %cst_63 = arith.constant 0.000000e+00 : f32
    %121 = vector.broadcast %cst_63 : f32 to vector<4x128xf32>
    %122 = arith.maximumf %120, %121 : vector<4x128xf32>
    %c0_64 = arith.constant 0 : index
    %c0_65 = arith.constant 0 : index
    %123 = vector.load %arg7[%c0_64, %c0_65] : memref<1x128xf32, #tpu.memory_space<vmem>>, vector<1x128xf32>
    %124 = vector.extract_strided_slice %115 {offsets = [0, 0], sizes = [1, 128], strides = [1, 1]} : vector<4x128xf32> to vector<1x128xf32>
    %125 = vector.extract_strided_slice %122 {offsets = [0, 0], sizes = [1, 128], strides = [1, 1]} : vector<4x128xf32> to vector<1x128xf32>
    %126 = tpu.concatenate %124, %125 in 0 : vector<1x128xf32>, vector<1x128xf32> -> vector<2x128xf32>
    %c0_66 = arith.constant 0 : index
    %c0_67 = arith.constant 0 : index
    %c0_68 = arith.constant 0 : index
    %127 = vector.load %arg6[%c0_66, %c0_67, %c0_68] : memref<4x128x128xf32, #tpu.memory_space<vmem>>, vector<1x128x128xf32>
    %128 = vector.shape_cast %127 : vector<1x128x128xf32> to vector<128x128xf32>
    %cst_69 = arith.constant dense<0.000000e+00> : vector<2x128xf32>
    %129 = tpu.matmul %126, %128, %cst_69 {dimension_numbers = #tpu.dot_dimension_numbers<[1], [0], [0], [1], [0, 0, 1, 1], [], []>} : vector<2x128xf32>, vector<128x128xf32>, vector<2x128xf32> -> vector<2x128xf32>
    %130 = vector.broadcast %123 : vector<1x128xf32> to vector<2x128xf32>
    %131 = arith.addf %130, %129 : vector<2x128xf32>
    %132 = vector.extract_strided_slice %115 {offsets = [1, 0], sizes = [1, 128], strides = [1, 1]} : vector<4x128xf32> to vector<1x128xf32>
    %133 = vector.extract_strided_slice %122 {offsets = [1, 0], sizes = [1, 128], strides = [1, 1]} : vector<4x128xf32> to vector<1x128xf32>
    %134 = tpu.concatenate %132, %133 in 0 : vector<1x128xf32>, vector<1x128xf32> -> vector<2x128xf32>
    %c1_70 = arith.constant 1 : index
    %c0_71 = arith.constant 0 : index
    %c0_72 = arith.constant 0 : index
    %135 = vector.load %arg6[%c1_70, %c0_71, %c0_72] : memref<4x128x128xf32, #tpu.memory_space<vmem>>, vector<1x128x128xf32>
    %136 = vector.shape_cast %135 : vector<1x128x128xf32> to vector<128x128xf32>
    %cst_73 = arith.constant dense<0.000000e+00> : vector<2x128xf32>
    %137 = tpu.matmul %134, %136, %cst_73 {dimension_numbers = #tpu.dot_dimension_numbers<[1], [0], [0], [1], [0, 0, 1, 1], [], []>} : vector<2x128xf32>, vector<128x128xf32>, vector<2x128xf32> -> vector<2x128xf32>
    %138 = arith.addf %131, %137 : vector<2x128xf32>
    %139 = vector.extract_strided_slice %115 {offsets = [2, 0], sizes = [1, 128], strides = [1, 1]} : vector<4x128xf32> to vector<1x128xf32>
    %140 = vector.extract_strided_slice %122 {offsets = [2, 0], sizes = [1, 128], strides = [1, 1]} : vector<4x128xf32> to vector<1x128xf32>
    %141 = tpu.concatenate %139, %140 in 0 : vector<1x128xf32>, vector<1x128xf32> -> vector<2x128xf32>
    %c2_74 = arith.constant 2 : index
    %c0_75 = arith.constant 0 : index
    %c0_76 = arith.constant 0 : index
    %142 = vector.load %arg6[%c2_74, %c0_75, %c0_76] : memref<4x128x128xf32, #tpu.memory_space<vmem>>, vector<1x128x128xf32>
    %143 = vector.shape_cast %142 : vector<1x128x128xf32> to vector<128x128xf32>
    %cst_77 = arith.constant dense<0.000000e+00> : vector<2x128xf32>
    %144 = tpu.matmul %141, %143, %cst_77 {dimension_numbers = #tpu.dot_dimension_numbers<[1], [0], [0], [1], [0, 0, 1, 1], [], []>} : vector<2x128xf32>, vector<128x128xf32>, vector<2x128xf32> -> vector<2x128xf32>
    %145 = arith.addf %138, %144 : vector<2x128xf32>
    %146 = vector.extract_strided_slice %115 {offsets = [3, 0], sizes = [1, 128], strides = [1, 1]} : vector<4x128xf32> to vector<1x128xf32>
    %147 = vector.extract_strided_slice %122 {offsets = [3, 0], sizes = [1, 128], strides = [1, 1]} : vector<4x128xf32> to vector<1x128xf32>
    %148 = tpu.concatenate %146, %147 in 0 : vector<1x128xf32>, vector<1x128xf32> -> vector<2x128xf32>
    %c3_78 = arith.constant 3 : index
    %c0_79 = arith.constant 0 : index
    %c0_80 = arith.constant 0 : index
    %149 = vector.load %arg6[%c3_78, %c0_79, %c0_80] : memref<4x128x128xf32, #tpu.memory_space<vmem>>, vector<1x128x128xf32>
    %150 = vector.shape_cast %149 : vector<1x128x128xf32> to vector<128x128xf32>
    %cst_81 = arith.constant dense<0.000000e+00> : vector<2x128xf32>
    %151 = tpu.matmul %148, %150, %cst_81 {dimension_numbers = #tpu.dot_dimension_numbers<[1], [0], [0], [1], [0, 0, 1, 1], [], []>} : vector<2x128xf32>, vector<128x128xf32>, vector<2x128xf32> -> vector<2x128xf32>
    %152 = arith.addf %145, %151 : vector<2x128xf32>
    %cst_82 = arith.constant 0.000000e+00 : f32
    %153 = vector.broadcast %cst_82 : f32 to vector<2x128xf32>
    %154 = arith.maximumf %152, %153 : vector<2x128xf32>
    %c0_83 = arith.constant 0 : index
    %c0_84 = arith.constant 0 : index
    %155 = vector.load %arg8[%c0_83, %c0_84] : memref<128x128xf32, #tpu.memory_space<vmem>>, vector<128x128xf32>
    %cst_85 = arith.constant dense<0.000000e+00> : vector<2x128xf32>
    %156 = tpu.matmul %154, %155, %cst_85 {dimension_numbers = #tpu.dot_dimension_numbers<[1], [0], [0], [1], [0, 0, 1, 1], [], []>} : vector<2x128xf32>, vector<128x128xf32>, vector<2x128xf32> -> vector<2x128xf32>
    %c0_86 = arith.constant 0 : index
    %c0_87 = arith.constant 0 : index
    %157 = vector.load %arg9[%c0_86, %c0_87] : memref<1x128xf32, #tpu.memory_space<vmem>>, vector<1x128xf32>
    %158 = vector.broadcast %157 : vector<1x128xf32> to vector<2x128xf32>
    %159 = arith.addf %156, %158 : vector<2x128xf32>
    %cst_88 = arith.constant 0.000000e+00 : f32
    %160 = vector.broadcast %cst_88 : f32 to vector<2x128xf32>
    %161 = arith.maximumf %159, %160 : vector<2x128xf32>
    %c0_89 = arith.constant 0 : index
    %c0_90 = arith.constant 0 : index
    %162 = vector.load %arg10[%c0_89, %c0_90] : memref<128x128xf32, #tpu.memory_space<vmem>>, vector<128x128xf32>
    %cst_91 = arith.constant dense<0.000000e+00> : vector<2x128xf32>
    %163 = tpu.matmul %161, %162, %cst_91 {dimension_numbers = #tpu.dot_dimension_numbers<[1], [0], [0], [1], [0, 0, 1, 1], [], []>} : vector<2x128xf32>, vector<128x128xf32>, vector<2x128xf32> -> vector<2x128xf32>
    %c0_92 = arith.constant 0 : index
    %c0_93 = arith.constant 0 : index
    %164 = vector.load %arg11[%c0_92, %c0_93] : memref<1x128xf32, #tpu.memory_space<vmem>>, vector<1x128xf32>
    %165 = vector.broadcast %164 : vector<1x128xf32> to vector<2x128xf32>
    %166 = arith.addf %163, %165 : vector<2x128xf32>
    %c0_94 = arith.constant 0 : index
    %c0_95 = arith.constant 0 : index
    %167 = vector.load %arg12[%c0_94, %c0_95] : memref<2x128xf32, #tpu.memory_space<vmem>>, vector<2x128xf32>
    tpu.vector_store %arg12[%c0_94, %c0_95], %166 {strides = array<i32>} : memref<2x128xf32, #tpu.memory_space<vmem>>, vector<2x128xf32>,
    return
  }
  func.func @transform_0(%arg0: i32) -> (i32, i32, i32, i32) {
    %c0_i32 = arith.constant 0 : i32
    %c0_i32_0 = arith.constant 0 : i32
    %c0_i32_1 = arith.constant 0 : i32
    %c0_i32_2 = arith.constant 0 : i32
    return %arg0, %c0_i32, %c0_i32_0, %c0_i32_1 : i32, i32, i32, i32
  }
  func.func @transform_1(%arg0: i32) -> (i32, i32, i32) {
    %c0_i32 = arith.constant 0 : i32
    %c0_i32_0 = arith.constant 0 : i32
    %c0_i32_1 = arith.constant 0 : i32
    %c0_i32_2 = arith.constant 0 : i32
    return %c0_i32, %c0_i32_0, %c0_i32_1 : i32, i32, i32
  }
  func.func @transform_2(%arg0: i32) -> (i32, i32) {
    %c0_i32 = arith.constant 0 : i32
    %c0_i32_0 = arith.constant 0 : i32
    %c0_i32_1 = arith.constant 0 : i32
    return %c0_i32, %c0_i32_0 : i32, i32
  }
  func.func @transform_3(%arg0: i32) -> (i32, i32, i32) {
    %c0_i32 = arith.constant 0 : i32
    %c0_i32_0 = arith.constant 0 : i32
    %c0_i32_1 = arith.constant 0 : i32
    %c0_i32_2 = arith.constant 0 : i32
    return %c0_i32, %c0_i32_0, %c0_i32_1 : i32, i32, i32
  }
  func.func @transform_4(%arg0: i32) -> (i32, i32) {
    %c0_i32 = arith.constant 0 : i32
    %c0_i32_0 = arith.constant 0 : i32
    %c0_i32_1 = arith.constant 0 : i32
    return %c0_i32, %c0_i32_0 : i32, i32
  }
  func.func @transform_5(%arg0: i32) -> (i32, i32, i32) {
    %c0_i32 = arith.constant 0 : i32
    %c0_i32_0 = arith.constant 0 : i32
    %c0_i32_1 = arith.constant 0 : i32
    %c0_i32_2 = arith.constant 0 : i32
    return %c0_i32, %c0_i32_0, %c0_i32_1 : i32, i32, i32
  }
  func.func @transform_6(%arg0: i32) -> (i32, i32) {
    %c0_i32 = arith.constant 0 : i32
    %c0_i32_0 = arith.constant 0 : i32
    %c0_i32_1 = arith.constant 0 : i32
    return %c0_i32, %c0_i32_0 : i32, i32
  }
  func.func @transform_7(%arg0: i32) -> (i32, i32) {
    %c0_i32 = arith.constant 0 : i32
    %c0_i32_0 = arith.constant 0 : i32
    %c0_i32_1 = arith.constant 0 : i32
    return %c0_i32, %c0_i32_0 : i32, i32
  }
  func.func @transform_8(%arg0: i32) -> (i32, i32) {
    %c0_i32 = arith.constant 0 : i32
    %c0_i32_0 = arith.constant 0 : i32
    %c0_i32_1 = arith.constant 0 : i32
    return %c0_i32, %c0_i32_0 : i32, i32
  }
  func.func @transform_9(%arg0: i32) -> (i32, i32) {
    %c0_i32 = arith.constant 0 : i32
    %c0_i32_0 = arith.constant 0 : i32
    %c0_i32_1 = arith.constant 0 : i32
    return %c0_i32, %c0_i32_0 : i32, i32
  }
  func.func @transform_10(%arg0: i32) -> (i32, i32) {
    %c0_i32 = arith.constant 0 : i32
    %c0_i32_0 = arith.constant 0 : i32
    %c0_i32_1 = arith.constant 0 : i32
    return %c0_i32, %c0_i32_0 : i32, i32
  }
  func.func @transform_11(%arg0: i32) -> (i32, i32) {
    %c0_i32 = arith.constant 0 : i32
    %c0_i32_0 = arith.constant 0 : i32
    return %arg0, %c0_i32 : i32, i32
  }
}

</mosaic_0001>

<bundles_post_ra>
// kernel: lenet5_forward.1
= control target key start
LH: loop header
LB: loop body
LE: loop exit
PB: predicated region body
PF: predicated region fallthrough
CT: control target
= control target key end

     0   :  { %16 = vsyncpa [#allocation3], 0  ;;  %s3832_s0 = inlined_call_operand.vmem [shape: f32[1,5,48,28], index: 0, kind: input, shape index: {}]   ;;  %s3833_s1 = inlined_call_operand.vmem [shape: f32[5,28,256], index: 1, kind: input, shape index: {}]   ;;  %s3834_s2 = inlined_call_operand.vmem [shape: f32[1,128], index: 2, kind: input, shape index: {}]   ;;  %s3835_s3 = inlined_call_operand.hbm [shape: f32[5,128,256], index: 3, kind: input, shape index: {}]   ;;  %s3836_s4 = inlined_call_operand.vmem [shape: f32[1,128], index: 4, kind: input, shape index: {}]   ;;  %s3837_s5 = inlined_call_operand.vmem [shape: f32[4,128,128], index: 5, kind: input, shape index: {}]   ;;  %s3838_s6 = inlined_call_operand.vmem [shape: f32[1,128], index: 6, kind: input, shape index: {}]   ;;  %s3839_s7 = inlined_call_operand.vmem [shape: f32[128,128], index: 7, kind: input, shape index: {}]   ;;  %s3840_s8 = inlined_call_operand.vmem [shape: f32[1,128], index: 8, kind: input, shape index: {}]   ;;  %s3841_s9 = inlined_call_operand.vmem [shape: f32[128,128], index: 9, kind: input, shape index: {}]   ;;  %s3842_s10 = inlined_call_operand.vmem [shape: f32[1,128], index: 10, kind: input, shape index: {}]   ;;  %s3843_s11 = inlined_call_operand.hbm [shape: f32[2,128], index: 11, kind: output, shape index: {}]  }
   0x1   :  { %17 = vsyncpa [#allocation4], 0  ;;  %s3012_s17 = smov [#allocation2]   ;;  %s2964_s21 = scalar_lea.hbm %s3835_s3, 20480 }
   0x2   :  { %s29_s18 = sshll.u32 %s3012_s17, 4  ;;  %p2965_p0 = scmp.ne.s32.totalorder %s3835_s3, %s2964_s21  ;;  %s30_s18 = int_to_ptr.vmem [resolvable:$true] %s29_s18 }
   0x3   :  { %p2968_p1 = scmp.lt.u32.totalorder %s2964_s21, %s3835_s3 }
   0x5   :  { %p2970_p2 = pnand %p2968_p1, %p2965_p0 }
   0x7   :  { %2973 = shalt.err (!%p2970_p2)
}
   0x8   :  { %s2974_s26 = scalar_lea.vmem %s30_s18, 20480  ;;  %p2979_p4 = scmp.lt.s32.totalorder %s30_s18, %s30_s18 }
   0x9   :  { %p2975_p3 = scmp.ne.s32.totalorder %s30_s18, %s2974_s26  ;;  %p2980_p5 = scmp.lt.s32.totalorder %s2974_s26, %s2974_s26 }
   0xb   :  { %p2981_p6 = por %p2980_p5, %p2979_p4 }
   0xd   :  { %p2982_p7 = pnand %p2981_p6, %p2975_p3 }
   0xf   :  { %2985 = shalt.err (!%p2982_p7)
}
  0x10   :  { %s3013_s27 = smov 256   ;;  %s3014_s28 = smov 16  }
  0x11   :  { %35 = dma.hbm_to_vmem [thread:$0]  %s3835_s3, 20480, %s30_s18, [#allocation3], %s3013_s27, %s3013_s27, %s3014_s28  }
  0x12   :  { %3008 = dma.done.wait [#allocation3], 20480  }
  0x13   :  { %3009 = vsyncadd [#allocation3], 4294946816  ;;  %v3015_v0 = vmov 0.0   ;;  %vm104_vm0 = vcmask 1043456   ;;  %v2077_v1 = vld [vmem:[%s3833_s1 + $0x48] sm:$0xff]  ;;  %v2079_v2 = vld [vmem:[%s3833_s1 + $0x58] sm:$0xff] }
  0x14   :  { %175 = vmatprep.mubr.f32.mxu0 %v3015_v0  ;;  %990 = vmatprep.mubr.f32.mxu1 %v3015_v0  ;;  %v2076_v3 = vld [vmem:[%s3833_s1 + $0x40] sm:$0xff]  ;;  %v2531_v4 = vpack.c.bf16 %v2079_v2, %v2077_v1  ;;  %v2078_v5 = vld [vmem:[%s3833_s1 + $0x50] sm:$0xff]  ;;  %v2081_v6 = vld [vmem:[%s3833_s1 + $0x68] sm:$0xff]  ;;  %vm3016_vm1 = vmmov 1   ;;  %vm85_vm3 = vcmask 228352   ;;  %vm804_vm4 = vcmask 1041408  }
  0x15   :  { %v2083_v7 = vld [vmem:[%s3833_s1 + $0x78] sm:$0xf]  ;;  %v2533_v8 = vpack.c.bf16 %v2078_v5, %v2076_v3  ;;  %vm3113_vm2 = vmpackc.low %vm104_vm0, %vm3016_vm1  ;;  %v2080_v11 = vld [vmem:[%s3833_s1 + $0x60] sm:$0xff]  ;;  %vm1083_vm5 = vcmask 1046528   ;;  %vm1211_vm6 = vcmask 1042432   ;;  %vm1342_vm7 = vcmask 1045504  }
  0x16   :  { %v2535_v9 = vpack.c.bf16 %v2083_v7, %v2081_v6  ;;  %v2082_v12 = vld [vmem:[%s3833_s1 + $0x70] sm:$0xf]  ;;  %2532 = vmatprep.subr.bf16.mxu0 %v2531_v4  ;;  %v62_v13 = vld [vmem:[%s3833_s1 + $0x8] sm:$0xff]  ;;  %v64_v14 = vld [vmem:[%s3833_s1 + $0x18] sm:$0xff]  ;;  %vm3018_vm8 = vmmov 0   ;;  %vm1493_vm9 = vcmask 1040384  }
  0x17   :  { %2534 = vmatpush1.bf16.msra.mxu0 %v2533_v8  ;;  %v2538_v15 = vpack.c.bf16 %v2082_v12, %v2080_v11  ;;  %v2541_v16 = vpack.c.bf16 %v64_v14, %v62_v13  ;;  %v61_v17 = vld [vmem:[%s3833_s1] sm:$0xff]  ;;  %v63_v18 = vld [vmem:[%s3833_s1 + $0x10] sm:$0xff]  ;;  %v66_v19 = vld [vmem:[%s3833_s1 + $0x28] sm:$0xff]  ;;  %s3019_s14 = smov [#allocation5]  }
  0x18   :  { %2537 = vmatprep.subr.msk.bf16.mxu0 %vm3113_vm2, %v2535_v9  ;;  %v68_v20 = vld [vmem:[%s3833_s1 + $0x38] sm:$0xf]  ;;  %v2070_v21 = vld [vmem:[%s3832_s0 + $0x30] sm:$0xff]  ;;  %v2543_v22 = vpack.c.bf16 %v63_v18, %v61_v17  ;;  %v65_v24 = vld [vmem:[%s3833_s1 + $0x20] sm:$0xff]  ;;  %s2061_s15 = sshll.u32 %s3019_s14, 4  ;;  %s2062_s15 = int_to_ptr.vmem [resolvable:$true] %s2061_s15 }
  0x19   :  { %v2545_v23 = vpack.c.bf16 %v68_v20, %v66_v19  ;;  %v67_v25 = vld [vmem:[%s3833_s1 + $0x30] sm:$0xf]  ;;  %v2107_v26 = vld [vmem:[%s3833_s1 + $0x88] sm:$0xff]  ;;  %v2109_v27 = vld [vmem:[%s3833_s1 + $0x98] sm:$0xff]  ;;  %p2991_p9 = scmp.lt.s32.totalorder %s2062_s15, %s2062_s15 }
  0x1a   :  { %v2071_v28 = vld [vmem:[%s3832_s0 + $0x38] sm:$0xff]  ;;  %v2548_v29 = vpack.c.bf16 %v67_v25, %v65_v24  ;;  %v2551_v30 = vpack.c.bf16 %v2109_v27, %v2107_v26  ;;  %v2072_v31 = vld [vmem:[%s3832_s0 + $0x40] sm:$0xff]  ;;  %v2073_v32 = vld [vmem:[%s3832_s0 + $0x48] sm:$0xff] }
  0x1b   :  { %2540 = vmatpush1.bf16.msk.msra.mxu0 %vm3113_vm2, %v2538_v15  ;;  %v2074_v33 = vld [vmem:[%s3832_s0 + $0x50] sm:$0xff]  ;;  %v895_v34 = vld [vmem:[#allocation2 + $0x108] sm:$0xff]  ;;  %v897_v35 = vld [vmem:[#allocation2 + $0x118] sm:$0xff] }
  0x1c   :  { %2542 = vmatprep.subr.bf16.mxu0 %v2541_v16  ;;  %v2581_v36 = vpack.c.bf16 %v897_v35, %v895_v34  ;;  %v894_v37 = vld [vmem:[#allocation2 + $0x100] sm:$0xff]  ;;  %v896_v38 = vld [vmem:[#allocation2 + $0x110] sm:$0xff]  ;;  %v899_v39 = vld [vmem:[#allocation2 + $0x128] sm:$0xff] }
  0x1d   :  { %v2583_v40 = vpack.c.bf16 %v896_v38, %v894_v37  ;;  %v901_v41 = vld [vmem:[#allocation2 + $0x138] sm:$0xff]  ;;  %v898_v42 = vld [vmem:[#allocation2 + $0x120] sm:$0xff]  ;;  %v900_v43 = vld [vmem:[#allocation2 + $0x130] sm:$0xff] }
  0x1e   :  { %2086 = vmatmul.mubr.msk.f32.vlgmr.msra.gmra.mrb[0].mxu0 %vm85_vm3, %v2070_v21  ;;  %2582 = vmatprep.subr.bf16.mxu1 %v2581_v36  ;;  %v2585_v44 = vpack.c.bf16 %v901_v41, %v899_v39  ;;  %v903_v45 = vld [vmem:[#allocation2 + $0x148] sm:$0xff]  ;;  %v905_v46 = vld [vmem:[#allocation2 + $0x158] sm:$0xff]  ;;  %v2587_v47 = vpack.c.bf16 %v900_v43, %v898_v42  ;;  %v902_v50 = vld [vmem:[#allocation2 + $0x140] sm:$0xff] }
  0x1f   :  { %2544 = vmatpush1.bf16.msra.mxu0 %v2543_v22  ;;  %181 = vmatprep.mubr.f32.mxu0 %v3015_v0  ;;  %v2075_v48 = vld [vmem:[%s3832_s0 + $0x58] sm:$0xff]  ;;  %v2589_v49 = vpack.c.bf16 %v905_v46, %v903_v45  ;;  %v904_v51 = vld [vmem:[#allocation2 + $0x150] sm:$0xff]  ;;  %v2106_v52 = vld [vmem:[%s3833_s1 + $0x80] sm:$0xff] }
  0x20   :  { %2547 = vmatprep.subr.msk.bf16.mxu0 %vm3113_vm2, %v2545_v23  ;;  %2584 = vmatpush1.bf16.msra.mxu1 %v2583_v40  ;;  %v2108_v53 = vld [vmem:[%s3833_s1 + $0x90] sm:$0xff]  ;;  %v2111_v54 = vld [vmem:[%s3833_s1 + $0xa8] sm:$0xff]  ;;  %v2113_v55 = vld [vmem:[%s3833_s1 + $0xb8] sm:$0xf]  ;;  %v2591_v56 = vpack.c.bf16 %v904_v51, %v902_v50 }
  0x21   :  { %2586 = vmatprep.subr.bf16.mxu1 %v2585_v44  ;;  %v55_v57 = vld [vmem:[%s3832_s0] sm:$0xff]  ;;  %v2553_v58 = vpack.c.bf16 %v2108_v53, %v2106_v52  ;;  %v2555_v59 = vpack.c.bf16 %v2113_v55, %v2111_v54  ;;  %v2112_v61 = vld [vmem:[%s3833_s1 + $0xb0] sm:$0xf]  ;;  %v2129_v62 = vld [vmem:[%s3833_s1 + $0xc8] sm:$0xff] }
  0x22   :  { %2087 = vmatmul.mubr.msk.f32.gmra.mrb[2].mxu0 %vm85_vm3, %v2071_v28  ;;  %v2110_v60 = vld [vmem:[%s3833_s1 + $0xa0] sm:$0xff]  ;;  %v2131_v63 = vld [vmem:[%s3833_s1 + $0xd8] sm:$0xff]  ;;  %v56_v1 = vld [vmem:[%s3832_s0 + $0x8] sm:$0xff] }
  0x23   :  { %187 = vmatprep.mubr.f32.mxu0 %v3015_v0  ;;  %2550 = vmatpush1.bf16.msk.msra.mxu0 %vm3113_vm2, %v2548_v29  ;;  %v2558_v2 = vpack.c.bf16 %v2112_v61, %v2110_v60  ;;  %v2561_v3 = vpack.c.bf16 %v2131_v63, %v2129_v62  ;;  %v57_v4 = vld [vmem:[%s3832_s0 + $0x10] sm:$0xff]  ;;  %v58_v5 = vld [vmem:[%s3832_s0 + $0x18] sm:$0xff]  ;;  %v59_v6 = vld [vmem:[%s3832_s0 + $0x20] sm:$0xff] }
  0x24   :  { %2552 = vmatprep.subr.bf16.mxu0 %v2551_v30  ;;  %2588 = vmatpush1.bf16.msra.mxu1 %v2587_v47  ;;  %v60_v7 = vld [vmem:[%s3832_s0 + $0x28] sm:$0xff]  ;;  %v2128_v8 = vld [vmem:[%s3833_s1 + $0xc0] sm:$0xff]  ;;  %v2130_v9 = vld [vmem:[%s3833_s1 + $0xd0] sm:$0xff] }
  0x25   :  { %2590 = vmatprep.subr.bf16.mxu1 %v2589_v49  ;;  %v2133_v11 = vld [vmem:[%s3833_s1 + $0xe8] sm:$0xff]  ;;  %v2135_v12 = vld [vmem:[%s3833_s1 + $0xf8] sm:$0xf]  ;;  %v2100_v13 = vld [vmem:[%s3832_s0 + $0x60] sm:$0xff]  ;;  %v2563_v14 = vpack.c.bf16 %v2130_v9, %v2128_v8 }
  0x26   :  { %2088 = vmatmul.mubr.msk.f32.gmra.mrb[4].mxu0 %vm85_vm3, %v2072_v31  ;;  %v2565_v15 = vpack.c.bf16 %v2135_v12, %v2133_v11  ;;  %v2132_v16 = vld [vmem:[%s3833_s1 + $0xe0] sm:$0xff]  ;;  %v2134_v17 = vld [vmem:[%s3833_s1 + $0xf0] sm:$0xf]  ;;  %v2151_v18 = vld [vmem:[%s3833_s1 + $0x108] sm:$0xff] }
  0x27   :  { %193 = vmatprep.mubr.f32.mxu0 %v3015_v0  ;;  %v2153_v19 = vld [vmem:[%s3833_s1 + $0x118] sm:$0xff]  ;;  %v2101_v20 = vld [vmem:[%s3832_s0 + $0x68] sm:$0xff]  ;;  %v2568_v21 = vpack.c.bf16 %v2134_v17, %v2132_v16  ;;  %v2102_v23 = vld [vmem:[%s3832_s0 + $0x70] sm:$0xff] }
  0x28   :  { %2592 = vmatpush1.bf16.msra.mxu1 %v2591_v56  ;;  %v2571_v22 = vpack.c.bf16 %v2153_v19, %v2151_v18  ;;  %v2103_v24 = vld [vmem:[%s3832_s0 + $0x78] sm:$0xff]  ;;  %v2104_v25 = vld [vmem:[%s3832_s0 + $0x80] sm:$0xff]  ;;  %v2105_v26 = vld [vmem:[%s3832_s0 + $0x88] sm:$0xff] }
  0x29   :  { %v2150_v27 = vld [vmem:[%s3833_s1 + $0x100] sm:$0xff]  ;;  %v2152_v28 = vld [vmem:[%s3833_s1 + $0x110] sm:$0xff]  ;;  %v2155_v29 = vld [vmem:[%s3833_s1 + $0x128] sm:$0xff] }
  0x2a   :  { %2089 = vmatmul.mubr.msk.f32.gmra.mrb[6].mxu0 %vm85_vm3, %v2073_v32  ;;  %v2157_v30 = vld [vmem:[%s3833_s1 + $0x138] sm:$0xf]  ;;  %v2122_v31 = vld [vmem:[%s3832_s0 + $0x90] sm:$0xff]  ;;  %v2573_v32 = vpack.c.bf16 %v2152_v28, %v2150_v27  ;;  %v2154_v34 = vld [vmem:[%s3833_s1 + $0x120] sm:$0xff] }
  0x2b   :  { %199 = vmatprep.mubr.f32.mxu0 %v3015_v0  ;;  %v2156_v35 = vld [vmem:[%s3833_s1 + $0x130] sm:$0xf]  ;;  %v2123_v36 = vld [vmem:[%s3832_s0 + $0x98] sm:$0xff]  ;;  %v2124_v38 = vld [vmem:[%s3832_s0 + $0xa0] sm:$0xff] }
  0x2c   :  { %v2578_v37 = vpack.c.bf16 %v2156_v35, %v2154_v34  ;;  %v2125_v39 = vld [vmem:[%s3832_s0 + $0xa8] sm:$0xff]  ;;  %v2126_v40 = vld [vmem:[%s3832_s0 + $0xb0] sm:$0xff]  ;;  %v2127_v10 = vld [vmem:[%s3832_s0 + $0xb8] sm:$0xff] }
  0x2d   :  { %v2144_v41 = vld [vmem:[%s3832_s0 + $0xc0] sm:$0xff]  ;;  %v2145_v42 = vld [vmem:[%s3832_s0 + $0xc8] sm:$0xff]  ;;  %v2146_v43 = vld [vmem:[%s3832_s0 + $0xd0] sm:$0xff] }
  0x2e   :  { %2090 = vmatmul.mubr.msk.f32.gmra.mrb[8].mxu0 %vm85_vm3, %v2074_v33  ;;  %v2575_v33 = vpack.c.bf16 %v2157_v30, %v2155_v29  ;;  %v2147_v44 = vld [vmem:[%s3832_s0 + $0xd8] sm:$0xff]  ;;  %v2148_v45 = vld [vmem:[%s3832_s0 + $0xe0] sm:$0xff]  ;;  %v2149_v46 = vld [vmem:[%s3832_s0 + $0xe8] sm:$0xff] }
  0x2f   :  { %205 = vmatprep.mubr.f32.mxu0 %v3015_v0  ;;  %v907_v47 = vld [vmem:[#allocation2 + $0x168] sm:$0xff]  ;;  %v906_v50 = vld [vmem:[#allocation2 + $0x160] sm:$0xff]  ;;  %v908_v51 = vld [vmem:[#allocation2 + $0x170] sm:$0xff] }
  0x30   :  { %v2595_v52 = vpack.c.bf16 %v908_v51, %v906_v50  ;;  %v911_v53 = vld [vmem:[#allocation2 + $0x188] sm:$0xff]  ;;  %v913_v54 = vld [vmem:[#allocation2 + $0x198] sm:$0xff]  ;;  %v910_v56 = vld [vmem:[#allocation2 + $0x180] sm:$0xff] }
  0x31   :  { %v2597_v55 = vpack.c.bf16 %v913_v54, %v911_v53  ;;  %v917_v60 = vld [vmem:[#allocation2 + $0x1b8] sm:$0xff]  ;;  %v914_v62 = vld [vmem:[#allocation2 + $0x1a0] sm:$0xff]  ;;  %v916_v63 = vld [vmem:[#allocation2 + $0x1b0] sm:$0xff] }
  0x32   :  { %2091 = vmatmul.mubr.msk.f32.gmra.mrb[10].mxu0 %vm85_vm3, %v2075_v48  ;;  %v909_v48 = vld [vmem:[#allocation2 + $0x178] sm:$0xff]  ;;  %v923_v8 = vld [vmem:[#allocation2 + $0x1e8] sm:$0xff]  ;;  %v922_v12 = vld [vmem:[#allocation2 + $0x1e0] sm:$0xff] }
  0x33   :  { %300 = vmatprep.mubr.f32.mxu0 %v3015_v0  ;;  %v2593_v49 = vpack.c.bf16 %v909_v48, %v907_v47  ;;  %v925_v9 = vld [vmem:[#allocation2 + $0x1f8] sm:$0xff]  ;;  %v3391_v28 = vld [vmem:[%s3834_s2] ss:$0 sm:$0xff] }
  0x34   :  { %v2609_v11 = vpack.c.bf16 %v925_v9, %v923_v8  ;;  %v850_v16 = vld [vmem:[#allocation2 + $0x18] sm:$0xff] }
  0x35   :  { %2594 = vmatprep.subr.bf16.mxu1 %v2593_v49 }
  0x36   :  { %2094 = vmatmul.mubr.msk.f32.vlgmr.msra.gmra.mrb[0].mxu0 %vm85_vm3, %v55_v57  ;;  %2596 = vmatpush1.bf16.msra.mxu1 %v2595_v52  ;;  %v912_v57 = vld [vmem:[#allocation2 + $0x190] sm:$0xff] }
  0x37   :  { %2554 = vmatpush1.bf16.msra.mxu0 %v2553_v58  ;;  %306 = vmatprep.mubr.f32.mxu0 %v3015_v0  ;;  %v2599_v58 = vpack.c.bf16 %v912_v57, %v910_v56 }
  0x38   :  { %2557 = vmatprep.subr.msk.bf16.mxu0 %vm3113_vm2, %v2555_v59  ;;  %2598 = vmatprep.subr.bf16.mxu1 %v2597_v55  ;;  %v915_v59 = vld [vmem:[#allocation2 + $0x1a8] sm:$0xff] }
  0x39   :  { %v2601_v61 = vpack.c.bf16 %v917_v60, %v915_v59 }
  0x3a   :  { %2095 = vmatmul.mubr.msk.f32.gmra.mrb[2].mxu0 %vm85_vm3, %v56_v1  ;;  %2600 = vmatpush1.bf16.msra.mxu1 %v2599_v58  ;;  %v2603_v1 = vpack.c.bf16 %v916_v63, %v914_v62 }
  0x3b   :  { %312 = vmatprep.mubr.f32.mxu0 %v3015_v0  ;;  %2560 = vmatpush1.bf16.msk.msra.mxu0 %vm3113_vm2, %v2558_v2  ;;  %v919_v2 = vld [vmem:[#allocation2 + $0x1c8] sm:$0xff] }
  0x3c   :  { %2562 = vmatprep.subr.bf16.mxu0 %v2561_v3  ;;  %2602 = vmatprep.subr.bf16.mxu1 %v2601_v61  ;;  %v921_v3 = vld [vmem:[#allocation2 + $0x1d8] sm:$0xff] }
  0x3e   :  { %2096 = vmatmul.mubr.msk.f32.gmra.mrb[4].mxu0 %vm85_vm3, %v57_v4  ;;  %2604 = vmatpush1.bf16.msra.mxu1 %v2603_v1  ;;  %v2605_v4 = vpack.c.bf16 %v921_v3, %v919_v2 }
  0x3f   :  { %318 = vmatprep.mubr.f32.mxu0 %v3015_v0 }
  0x40   :  { %2606 = vmatprep.subr.bf16.mxu1 %v2605_v4 }
  0x42   :  { %2097 = vmatmul.mubr.msk.f32.gmra.mrb[6].mxu0 %vm85_vm3, %v58_v5  ;;  %v918_v5 = vld [vmem:[#allocation2 + $0x1c0] sm:$0xff] }
  0x43   :  { %324 = vmatprep.mubr.f32.mxu0 %v3015_v0 }
  0x46   :  { %2098 = vmatmul.mubr.msk.f32.gmra.mrb[8].mxu0 %vm85_vm3, %v59_v6  ;;  %v920_v6 = vld [vmem:[#allocation2 + $0x1d0] sm:$0xff] }
  0x47   :  { %330 = vmatprep.mubr.f32.mxu0 %v3015_v0 }
  0x4a   :  { %2099 = vmatmul.mubr.msk.f32.gmra.mrb[10].mxu0 %vm85_vm3, %v60_v7  ;;  %v2607_v7 = vpack.c.bf16 %v920_v6, %v918_v5  ;;  %v851_v5 = vld [vmem:[#allocation2 + $0x20] sm:$0xff]  ;;  %v853_v6 = vld [vmem:[#allocation2 + $0x30] sm:$0xff] }
  0x4b   :  { %441 = vmatprep.mubr.f32.mxu0 %v3015_v0 }
  0x4c   :  { %2608 = vmatpush1.bf16.msra.mxu1 %v2607_v7 }
  0x4d   :  { %2610 = vmatprep.subr.bf16.mxu1 %v2609_v11 }
  0x4e   :  { %2116 = vmatmul.mubr.msk.f32.vlgmr.msra.gmra.mrb[0].mxu0 %vm85_vm3, %v2100_v13  ;;  %v924_v13 = vld [vmem:[#allocation2 + $0x1f0] sm:$0xff] }
  0x4f   :  { %2564 = vmatpush1.bf16.msra.mxu0 %v2563_v14  ;;  %447 = vmatprep.mubr.f32.mxu0 %v3015_v0  ;;  %v2611_v14 = vpack.c.bf16 %v924_v13, %v922_v12  ;;  %v856_v12 = vld [vmem:[#allocation2 + $0x48] sm:$0xff]  ;;  %v858_v13 = vld [vmem:[#allocation2 + $0x58] sm:$0xff] }
  0x50   :  { %2567 = vmatprep.subr.msk.bf16.mxu0 %vm3113_vm2, %v2565_v15  ;;  %v848_v15 = vld [vmem:[#allocation2 + $0x8] sm:$0xff] }
  0x51   :  { %2612 = vmatpush1.bf16.msra.mxu1 %v2611_v14  ;;  %v2613_v17 = vpack.c.bf16 %v850_v16, %v848_v15 }
  0x52   :  { %2117 = vmatmul.mubr.msk.f32.gmra.mrb[2].mxu0 %vm85_vm3, %v2101_v20 }
  0x53   :  { %453 = vmatprep.mubr.f32.mxu0 %v3015_v0  ;;  %2570 = vmatpush1.bf16.msk.msra.mxu0 %vm3113_vm2, %v2568_v21 }
  0x54   :  { %2572 = vmatprep.subr.bf16.mxu0 %v2571_v22  ;;  %2614 = vmatprep.subr.bf16.mxu1 %v2613_v17 }
  0x56   :  { %2118 = vmatmul.mubr.msk.f32.gmra.mrb[4].mxu0 %vm85_vm3, %v2102_v23 }
  0x57   :  { %459 = vmatprep.mubr.f32.mxu0 %v3015_v0 }
  0x5a   :  { %2119 = vmatmul.mubr.msk.f32.gmra.mrb[6].mxu0 %vm85_vm3, %v2103_v24 }
  0x5b   :  { %465 = vmatprep.mubr.f32.mxu0 %v3015_v0 }
  0x5e   :  { %2120 = vmatmul.mubr.msk.f32.gmra.mrb[8].mxu0 %vm85_vm3, %v2104_v25 }
  0x5f   :  { %471 = vmatprep.mubr.f32.mxu0 %v3015_v0 }
  0x62   :  { %2121 = vmatmul.mubr.msk.f32.gmra.mrb[10].mxu0 %vm85_vm3, %v2105_v26 }
  0x63   :  { %594 = vmatprep.mubr.f32.mxu0 %v3015_v0 }
  0x66   :  { %2138 = vmatmul.mubr.msk.f32.vlgmr.msra.gmra.mrb[0].mxu0 %vm85_vm3, %v2122_v31 }
  0x67   :  { %2574 = vmatpush1.bf16.msra.mxu0 %v2573_v32  ;;  %600 = vmatprep.mubr.f32.mxu0 %v3015_v0 }
  0x68   :  { %2577 = vmatprep.subr.msk.bf16.mxu0 %vm3113_vm2, %v2575_v33 }
  0x6a   :  { %2139 = vmatmul.mubr.msk.f32.gmra.mrb[2].mxu0 %vm85_vm3, %v2123_v36 }
  0x6b   :  { %606 = vmatprep.mubr.f32.mxu0 %v3015_v0  ;;  %2580 = vmatpush1.bf16.msk.msra.mxu0 %vm3113_vm2, %v2578_v37 }
  0x6e   :  { %2140 = vmatmul.mubr.msk.f32.gmra.mrb[4].mxu0 %vm85_vm3, %v2124_v38 }
  0x6f   :  { %612 = vmatprep.mubr.f32.mxu0 %v3015_v0 }
  0x72   :  { %2141 = vmatmul.mubr.msk.f32.gmra.mrb[6].mxu0 %vm85_vm3, %v2125_v39  ;;  %v847_v39 = vld [vmem:[#allocation2] sm:$0xff] }
  0x73   :  { %618 = vmatprep.mubr.f32.mxu0 %v3015_v0 }
  0x76   :  { %2142 = vmatmul.mubr.msk.f32.gmra.mrb[8].mxu0 %vm85_vm3, %v2126_v40  ;;  %v849_v40 = vld [vmem:[#allocation2 + $0x10] sm:$0xff] }
  0x77   :  { %624 = vmatprep.mubr.f32.mxu0 %v3015_v0  ;;  %v2615_v47 = vpack.c.bf16 %v849_v40, %v847_v39  ;;  %v1496_v39 = vld [vmem:[%s3837_s5 + $0x8] sm:$0xff]  ;;  %v1497_v40 = vld [vmem:[%s3837_s5 + $0x10] sm:$0xff] }
  0x7a   :  { %2143 = vmatmul.mubr.msk.f32.gmra.mrb[10].mxu0 %vm85_vm3, %v2127_v10 }
  0x7b   :  { %747 = vmatprep.mubr.f32.mxu0 %v3015_v0 }
  0x7e   :  { %2160 = vmatmul.mubr.msk.f32.vlgmr.msra.gmra.mrb[0].mxu0 %vm85_vm3, %v2144_v41  ;;  %v852_v41 = vld [vmem:[#allocation2 + $0x28] sm:$0xff] }
  0x7f   :  { %753 = vmatprep.mubr.f32.mxu0 %v3015_v0 }
  0x82   :  { %2161 = vmatmul.mubr.msk.f32.gmra.mrb[2].mxu0 %vm85_vm3, %v2145_v42  ;;  %v854_v42 = vld [vmem:[#allocation2 + $0x38] sm:$0xff] }
  0x83   :  { %759 = vmatprep.mubr.f32.mxu0 %v3015_v0  ;;  %v2617_v51 = vpack.c.bf16 %v854_v42, %v852_v41  ;;  %v3017_v42 = vmov 0.0|0.0  }
  0x84   :  { %2741 = vmatprep.subr.bf16.mxu0 %v3017_v42 }
  0x86   :  { %2162 = vmatmul.mubr.msk.f32.gmra.mrb[4].mxu0 %vm85_vm3, %v2146_v43 }
  0x87   :  { %765 = vmatprep.mubr.f32.mxu0 %v3015_v0 }
  0x8a   :  { %2163 = vmatmul.mubr.msk.f32.gmra.mrb[6].mxu0 %vm85_vm3, %v2147_v44 }
  0x8b   :  { %771 = vmatprep.mubr.f32.mxu0 %v3015_v0 }
  0x8e   :  { %2164 = vmatmul.mubr.msk.f32.gmra.mrb[8].mxu0 %vm85_vm3, %v2148_v45 }
  0x8f   :  { %777 = vmatprep.mubr.f32.mxu0 %v3015_v0 }
  0x92   :  { %2165 = vmatmul.mubr.msk.f32.gmra.mrb[10].mxu0 %vm85_vm3, %v2149_v46 }
  0x93   :  { %2353 = vmatprep.mubr.msk.f32.mxu0 %vm3018_vm8, %v3015_v0 }
 0x151   :  { %v749_v18 = vpop.f32.mrb[0].mxu0 }
 0x152   :  { %v751_v19 = vpop.f32.mrb[1].mxu0 }
 0x153   :  { %v796_v20 = vmax.f32 %v749_v18, %v751_v19 }
 0x155   :  { %v755_v21 = vpop.f32.mrb[2].mxu0  ;;  %v805_v24 = vrot.slane %v796_v20, 6 }
 0x156   :  { %v757_v22 = vpop.f32.mrb[3].mxu0 }
 0x157   :  { %v797_v23 = vmax.f32 %v755_v21, %v757_v22  ;;  %v2619_v21 = vpack.c.bf16 %v853_v6, %v851_v5  ;;  %v855_v22 = vld [vmem:[#allocation2 + $0x40] sm:$0xff]  ;;  %v868_v5 = vld [vmem:[#allocation2 + $0xa8] sm:$0xff]  ;;  %v870_v6 = vld [vmem:[#allocation2 + $0xb8] sm:$0xff] }
 0x159   :  { %v806_v25 = vrot.slane %v797_v23, 6  ;;  %v761_v26 = vpop.f32.mrb[4].mxu0 }
 0x15a   :  { %v763_v27 = vpop.f32.mrb[5].mxu0 }
 0x15b   :  { %v807_v29 = vsel %vm804_vm4, %v805_v24, %v806_v25  ;;  %v798_v30 = vmax.f32 %v761_v26, %v763_v27  ;;  %v2621_v27 = vpack.c.bf16 %v858_v13, %v856_v12 }
 0x15c   :  { %v809_v31 = vmax.f32 %v796_v20, %v807_v29  ;;  %v860_v29 = vld [vmem:[#allocation2 + $0x68] sm:$0xff] }
 0x15d   :  { %v819_v32 = vrot.slane %v798_v30, 6  ;;  %v767_v33 = vpop.f32.mrb[6].mxu0 }
 0x15e   :  { %v816_v34 = vadd.f32 %v3391_v28, %v809_v31  ;;  %v769_v35 = vpop.f32.mrb[7].mxu0  ;;  %v859_v31 = vld [vmem:[#allocation2 + $0x60] sm:$0xff] }
 0x15f   :  { %v821_v36 = vmax.f32 %v797_v23, %v819_v32  ;;  %v822_v37 = vmax.f32 %v798_v30, %v819_v32  ;;  %v799_v38 = vmax.f32 %v767_v33, %v769_v35  ;;  %v857_v23 = vld [vmem:[#allocation2 + $0x50] sm:$0xff]  ;;  %v862_v30 = vld [vmem:[#allocation2 + $0x78] sm:$0xff] }
 0x160   :  { %v817_v10 = vmax.f32 %v816_v34, 0.0  ;;  %v861_v33 = vld [vmem:[#allocation2 + $0x70] sm:$0xff]  ;;  %v864_v34 = vld [vmem:[#allocation2 + $0x88] sm:$0xff]  ;;  %v866_v35 = vld [vmem:[#allocation2 + $0x98] sm:$0xff]  ;;  %v2625_v41 = vpack.c.bf16 %v862_v30, %v860_v29 }
 0x161   :  { %v823_v43 = vadd.f32 %v3391_v28, %v821_v36  ;;  %v824_v44 = vadd.f32 %v3391_v28, %v822_v37  ;;  %v773_v45 = vpop.f32.mrb[8].mxu0  ;;  %v829_v52 = vrot.slane %v799_v38, 6  ;;  %v871_v29 = vld [vmem:[#allocation2 + $0xc0] sm:$0xff]  ;;  %v873_v30 = vld [vmem:[#allocation2 + $0xd0] sm:$0xff] }
 0x162   :  { %v775_v46 = vpop.f32.mrb[9].mxu0  ;;  %v883_v53 = vrot.slane %v817_v10, 5  ;;  %v1080_v54 = vrot.slane %v817_v10, 1  ;;  %v1216_v55 = vrot.slane %v817_v10, 6  ;;  %v1340_v7 = vrot.slane %v817_v10, 2 }
 0x163   :  { %v825_v48 = vmax.f32 %v823_v43, 0.0  ;;  %v826_v49 = vmax.f32 %v824_v44, 0.0  ;;  %v800_v50 = vmax.f32 %v773_v45, %v775_v46  ;;  %v2627_v45 = vpack.c.bf16 %v861_v33, %v859_v31  ;;  %v876_v31 = vld [vmem:[#allocation2 + $0xe8] sm:$0xff] }
 0x164   :  { %v2639_v33 = vpack.c.bf16 %v873_v30, %v871_v29  ;;  %v1228_v29 = vld [vmem:[#allocation2 + $0x308] sm:$0xff]  ;;  %v1230_v30 = vld [vmem:[#allocation2 + $0x318] sm:$0xff] }
 0x165   :  { %v1085_v56 = vrot.slane %v826_v49, 1  ;;  %v1213_v57 = vrot.slane %v826_v49, 5  ;;  %v1344_v58 = vrot.slane %v826_v49, 2  ;;  %v830_v59 = vrot.slane %v800_v50, 6  ;;  %v779_v60 = vpop.f32.mrb[10].mxu0 }
 0x166   :  { %v781_v61 = vpop.f32.mrb[11].mxu0  ;;  %v880_v62 = vrot.slane %v825_v48, 4  ;;  %v3398_v63 = vsel %vm104_vm0, %v817_v10, %v825_v48  ;;  %v1084_v1 = vrot.slane %v825_v48, 1  ;;  %v1212_v2 = vrot.slane %v825_v48, 5 }
 0x167   :  { %v831_v3 = vsel %vm804_vm4, %v829_v52, %v830_v59  ;;  %v801_v4 = vmax.f32 %v779_v60, %v781_v61  ;;  %v1343_v8 = vrot.slane %v825_v48, 2  ;;  %v2623_v10 = vpack.c.bf16 %v857_v23, %v855_v22  ;;  %v1499_v59 = vld [vmem:[%s3837_s5 + $0x20] sm:$0xff]  ;;  %v1500_v60 = vld [vmem:[%s3837_s5 + $0x28] sm:$0xff]  ;;  %v874_v23 = vld [vmem:[#allocation2 + $0xd8] sm:$0xff] }
 0x168   :  { %v833_v9 = vmax.f32 %v799_v38, %v831_v3  ;;  %v891_v11 = vsel %vm104_vm0, %v880_v62, %v883_v53  ;;  %v1086_v14 = vsel %vm1083_vm5, %v1084_v1, %v1085_v56  ;;  %v1214_v15 = vsel %vm1211_vm6, %v1212_v2, %v1213_v57  ;;  %v1495_v38 = vld [vmem:[%s3837_s5] sm:$0xff]  ;;  %v865_v1 = vld [vmem:[#allocation2 + $0x90] sm:$0xff]  ;;  %v872_v22 = vld [vmem:[#allocation2 + $0xc8] sm:$0xff] }
 0x169   :  { %v837_v16 = vrot.slane %v801_v4, 6  ;;  %991 = vmatmul.mubr.f32.vlgmr.msra.gmra.mrb[0].mxu1 %v891_v11  ;;  %v3405_v17 = vsel %vm104_vm0, %v1080_v54, %v1086_v14  ;;  %v3408_v18 = vsel %vm104_vm0, %v1214_v15, %v1216_v55  ;;  %v1345_v19 = vsel %vm1342_vm7, %v1343_v8, %v1344_v58  ;;  %v863_v62 = vld [vmem:[#allocation2 + $0x80] sm:$0xff]  ;;  %v1501_v15 = vld [vmem:[%s3837_s5 + $0x30] sm:$0xff] }
 0x16a   :  { %v834_v20 = vadd.f32 %v3391_v28, %v833_v9  ;;  %2616 = vmatpush1.bf16.msra.mxu1 %v2615_v47  ;;  %996 = vmatprep.mubr.f32.mxu1 %v3015_v0  ;;  %v3414_v24 = vsel %vm104_vm0, %v1340_v7, %v1345_v19  ;;  %v2742_v46 = vpack.c.bf16 %v1496_v39, %v1495_v38  ;;  %v1101_v38 = vld [vmem:[#allocation2 + $0x218] sm:$0xff] }
 0x16b   :  { %v839_v25 = vmax.f32 %v800_v50, %v837_v16  ;;  %v840_v26 = vmax.f32 %v801_v4, %v837_v16  ;;  %2618 = vmatprep.subr.bf16.mxu1 %v2617_v51  ;;  %v2629_v48 = vpack.c.bf16 %v866_v35, %v864_v34  ;;  %v2748_v13 = vpack.c.bf16 %v1500_v60, %v1499_v59  ;;  %v1502_v16 = vld [vmem:[%s3837_s5 + $0x38] sm:$0xff]  ;;  %v875_v35 = vld [vmem:[#allocation2 + $0xe0] sm:$0xff]  ;;  %v1115_v60 = vld [vmem:[#allocation2 + $0x288] sm:$0xff] }
 0x16c   :  { %v835_v32 = vmax.f32 %v834_v20, 0.0  ;;  %2743 = vmatpush3.bf16.msra.mxu0 %v2742_v46  ;;  %v2631_v14 = vpack.c.bf16 %v865_v1, %v863_v62  ;;  %v2633_v19 = vpack.c.bf16 %v870_v6, %v868_v5  ;;  %v867_v20 = vld [vmem:[#allocation2 + $0xa0] sm:$0xff]  ;;  %v1121_v5 = vld [vmem:[#allocation2 + $0x2b8] sm:$0xff] }
 0x16d   :  { %v841_v36 = vadd.f32 %v3391_v28, %v839_v25  ;;  %v842_v37 = vadd.f32 %v3391_v28, %v840_v26  ;;  %v1498_v28 = vld [vmem:[%s3837_s5 + $0x18] sm:$0xff]  ;;  %2744 = vmatprep.subr.bf16.mxu0 %v3017_v42  ;;  %v2751_v25 = vpack.c.bf16 %v1502_v16, %v1501_v15  ;;  %v1102_v46 = vld [vmem:[#allocation2 + $0x220] sm:$0xff] }
 0x16e   :  { %2620 = vmatpush1.bf16.msra.mxu1 %v2619_v21  ;;  %v889_v47 = vrot.slane %v835_v32, 5  ;;  %v1088_v49 = vrot.slane %v835_v32, 1  ;;  %v2745_v50 = vpack.c.bf16 %v1498_v28, %v1497_v40  ;;  %v1222_v3 = vrot.slane %v835_v32, 6  ;;  %v869_v21 = vld [vmem:[#allocation2 + $0xb0] sm:$0xff]  ;;  %v1103_v28 = vld [vmem:[#allocation2 + $0x228] sm:$0xff]  ;;  %v1110_v59 = vld [vmem:[#allocation2 + $0x260] sm:$0xff] }
 0x16f   :  { %v843_v43 = vmax.f32 %v841_v36, 0.0  ;;  %v844_v44 = vmax.f32 %v842_v37, 0.0  ;;  %2622 = vmatprep.subr.bf16.mxu1 %v2621_v27  ;;  %v1347_v4 = vrot.slane %v835_v32, 2  ;;  %v2635_v26 = vpack.c.bf16 %v869_v21, %v867_v20  ;;  %v877_v36 = vld [vmem:[#allocation2 + $0xf0] sm:$0xff]  ;;  %v1099_v37 = vld [vmem:[#allocation2 + $0x208] sm:$0xff] }
 0x170   :  { %2746 = vmatpush3.bf16.msra.mxu0 %v2745_v50  ;;  %v2637_v27 = vpack.c.bf16 %v874_v23, %v872_v22  ;;  %v2643_v39 = vpack.c.bf16 %v877_v36, %v875_v35  ;;  %v2645_v40 = vpack.c.bf16 %v1101_v38, %v1099_v37  ;;  %v1124_v20 = vld [vmem:[#allocation2 + $0x2d0] sm:$0xff]  ;;  %v1127_v21 = vld [vmem:[#allocation2 + $0x2e8] sm:$0xff]  ;;  %v1129_v22 = vld [vmem:[#allocation2 + $0x2f8] sm:$0xff] }
 0x171   :  { %v886_v51 = vrot.slane %v843_v43, 4  ;;  %v3432_v52 = vsel %vm104_vm0, %v835_v32, %v843_v43  ;;  %v1091_v53 = vrot.slane %v843_v43, 1  ;;  %v1092_v54 = vrot.slane %v844_v44, 1  ;;  %2747 = vmatprep.subr.bf16.mxu0 %v3017_v42  ;;  %v878_v32 = vld [vmem:[#allocation2 + $0xf8] sm:$0xff]  ;;  %v1232_v35 = vld [vmem:[#allocation2 + $0x328] sm:$0xff] }
 0x172   :  { %2624 = vmatpush1.bf16.msra.mxu1 %v2623_v10  ;;  %v1218_v55 = vrot.slane %v843_v43, 5  ;;  %v1219_v56 = vrot.slane %v844_v44, 5  ;;  %v1349_v57 = vrot.slane %v843_v43, 2  ;;  %v1350_v58 = vrot.slane %v844_v44, 2  ;;  %v1098_v10 = vld [vmem:[#allocation2 + $0x200] sm:$0xff]  ;;  %v1105_v43 = vld [vmem:[#allocation2 + $0x238] sm:$0xff] }
 0x173   :  { %2626 = vmatprep.subr.bf16.mxu1 %v2625_v41  ;;  %v892_v61 = vsel %vm104_vm0, %v886_v51, %v889_v47  ;;  %v1093_v2 = vsel %vm1083_vm5, %v1091_v53, %v1092_v54  ;;  %v2641_v34 = vpack.c.bf16 %v878_v32, %v876_v31  ;;  %v1100_v41 = vld [vmem:[#allocation2 + $0x210] sm:$0xff]  ;;  %v1106_v53 = vld [vmem:[#allocation2 + $0x240] sm:$0xff]  ;;  %v2677_v32 = vpack.c.bf16 %v1230_v30, %v1228_v29  ;;  %v1234_v36 = vld [vmem:[#allocation2 + $0x338] sm:$0xff] }
 0x174   :  { %997 = vmatmul.mubr.f32.gmra.mrb[2].mxu1 %v892_v61  ;;  %v3444_v7 = vsel %vm104_vm0, %v1088_v49, %v1093_v2  ;;  %v1220_v8 = vsel %vm1211_vm6, %v1218_v55, %v1219_v56  ;;  %v1351_v9 = vsel %vm1342_vm7, %v1349_v57, %v1350_v58  ;;  %2749 = vmatpush3.bf16.msra.mxu0 %v2748_v13  ;;  %v1104_v47 = vld [vmem:[#allocation2 + $0x230] sm:$0xff]  ;;  %v1109_v49 = vld [vmem:[#allocation2 + $0x258] sm:$0xff]  ;;  %v1111_v55 = vld [vmem:[#allocation2 + $0x268] sm:$0xff] }
 0x175   :  { %1067 = vmatprep.mubr.f32.mxu1 %v3015_v0  ;;  %v3450_v11 = vsel %vm104_vm0, %v1220_v8, %v1222_v3  ;;  %v3453_v12 = vsel %vm104_vm0, %v1347_v4, %v1351_v9  ;;  %2750 = vmatprep.subr.bf16.mxu0 %v3017_v42  ;;  %v2647_v44 = vpack.c.bf16 %v1100_v41, %v1098_v10  ;;  %v1108_v54 = vld [vmem:[#allocation2 + $0x250] sm:$0xff]  ;;  %v1113_v56 = vld [vmem:[#allocation2 + $0x278] sm:$0xff]  ;;  %v1114_v2 = vld [vmem:[#allocation2 + $0x280] sm:$0xff] }
 0x176   :  { %2628 = vmatpush1.bf16.msra.mxu1 %v2627_v45  ;;  %v2649_v45 = vpack.c.bf16 %v1105_v43, %v1103_v28  ;;  %v2651_v50 = vpack.c.bf16 %v1104_v47, %v1102_v46  ;;  %v2655_v57 = vpack.c.bf16 %v1108_v54, %v1106_v53  ;;  %v2657_v58 = vpack.c.bf16 %v1113_v56, %v1111_v55  ;;  %v1117_v61 = vld [vmem:[#allocation2 + $0x298] sm:$0xff]  ;;  %v1116_v3 = vld [vmem:[#allocation2 + $0x290] sm:$0xff]  ;;  %v1119_v4 = vld [vmem:[#allocation2 + $0x2a8] sm:$0xff] }
 0x177   :  { %2630 = vmatprep.subr.bf16.mxu1 %v2629_v48  ;;  %v1107_v48 = vld [vmem:[#allocation2 + $0x248] sm:$0xff]  ;;  %v2661_v1 = vpack.c.bf16 %v1117_v61, %v1115_v60  ;;  %v2665_v6 = vpack.c.bf16 %v1121_v5, %v1119_v4  ;;  %v1118_v8 = vld [vmem:[#allocation2 + $0x2a0] sm:$0xff]  ;;  %v1120_v9 = vld [vmem:[#allocation2 + $0x2b0] sm:$0xff]  ;;  %v2681_v38 = vpack.c.bf16 %v1234_v36, %v1232_v35 }
 0x178   :  { %2752 = vmatpush3.bf16.msra.mxu0 %v2751_v25  ;;  %v2653_v51 = vpack.c.bf16 %v1109_v49, %v1107_v48  ;;  %v1123_v13 = vld [vmem:[#allocation2 + $0x2c8] sm:$0xff]  ;;  %v2667_v15 = vpack.c.bf16 %v1120_v9, %v1118_v8  ;;  %v2673_v25 = vpack.c.bf16 %v1129_v22, %v1127_v21  ;;  %v1238_v41 = vld [vmem:[#allocation2 + $0x358] sm:$0xff]  ;;  %v1243_v56 = vld [vmem:[#allocation2 + $0x380] sm:$0xff] }
 0x179   :  { %2753 = vmatprep.subr.bf16.mxu0 %v3017_v42  ;;  %v1236_v10 = vld [vmem:[#allocation2 + $0x348] sm:$0xff]  ;;  %v1242_v47 = vld [vmem:[#allocation2 + $0x378] sm:$0xff]  ;;  %v1247_v60 = vld [vmem:[#allocation2 + $0x3a0] sm:$0xff] }
 0x17a   :  { %2632 = vmatpush1.bf16.msra.mxu1 %v2631_v14  ;;  %v1125_v14 = vld [vmem:[#allocation2 + $0x2d8] sm:$0xff]  ;;  %v2685_v43 = vpack.c.bf16 %v1238_v41, %v1236_v10  ;;  %v1240_v46 = vld [vmem:[#allocation2 + $0x368] sm:$0xff]  ;;  %v1249_v61 = vld [vmem:[#allocation2 + $0x3b0] sm:$0xff] }
 0x17b   :  { %2634 = vmatprep.subr.bf16.mxu1 %v2633_v19  ;;  %v2669_v16 = vpack.c.bf16 %v1125_v14, %v1123_v13  ;;  %v1122_v19 = vld [vmem:[#allocation2 + $0x2c0] sm:$0xff]  ;;  %v2689_v49 = vpack.c.bf16 %v1242_v47, %v1240_v46  ;;  %v1246_v53 = vld [vmem:[#allocation2 + $0x398] sm:$0xff]  ;;  %v1253_v5 = vld [vmem:[#allocation2 + $0x3d0] sm:$0xff] }
 0x17c   :  { %v2671_v23 = vpack.c.bf16 %v1124_v20, %v1122_v19  ;;  %v1251_v4 = vld [vmem:[#allocation2 + $0x3c0] sm:$0xff]  ;;  %v1257_v14 = vld [vmem:[#allocation2 + $0x3f0] sm:$0xff]  ;;  %v1373_v41 = vld [vmem:[#allocation2 + $0x488] sm:$0xff] }
 0x17d   :  { %v2703_v8 = vpack.c.bf16 %v1253_v5, %v1251_v4  ;;  %v1255_v13 = vld [vmem:[#allocation2 + $0x3e0] sm:$0xff]  ;;  %v1358_v22 = vld [vmem:[#allocation2 + $0x410] sm:$0xff]  ;;  %v1377_v47 = vld [vmem:[#allocation2 + $0x4a8] sm:$0xff] }
 0x17e   :  { %2636 = vmatpush1.bf16.msra.mxu1 %v2635_v26  ;;  %v1126_v26 = vld [vmem:[#allocation2 + $0x2e0] sm:$0xff]  ;;  %v2707_v19 = vpack.c.bf16 %v1257_v14, %v1255_v13  ;;  %v1362_v30 = vld [vmem:[#allocation2 + $0x430] sm:$0xff] }
 0x17f   :  { %2638 = vmatprep.subr.bf16.mxu1 %v2637_v27  ;;  %v1128_v27 = vld [vmem:[#allocation2 + $0x2f0] sm:$0xff]  ;;  %v1356_v21 = vld [vmem:[#allocation2 + $0x400] sm:$0xff] }
 0x180   :  { %v2675_v31 = vpack.c.bf16 %v1128_v27, %v1126_v26  ;;  %v2711_v26 = vpack.c.bf16 %v1358_v22, %v1356_v21  ;;  %v1360_v29 = vld [vmem:[#allocation2 + $0x420] sm:$0xff]  ;;  %v1366_v36 = vld [vmem:[#allocation2 + $0x450] sm:$0xff] }
 0x181   :  { %v1364_v35 = vld [vmem:[#allocation2 + $0x440] sm:$0xff]  ;;  %v1374_v46 = vld [vmem:[#allocation2 + $0x490] sm:$0xff] }
 0x182   :  { %2640 = vmatpush1.bf16.msra.mxu1 %v2639_v33  ;;  %v1227_v33 = vld [vmem:[#allocation2 + $0x300] sm:$0xff] }
 0x183   :  { %2642 = vmatprep.subr.bf16.mxu1 %v2641_v34  ;;  %v1229_v34 = vld [vmem:[#allocation2 + $0x310] sm:$0xff]  ;;  %v1368_v10 = vld [vmem:[#allocation2 + $0x460] sm:$0xff] }
 0x184   :  { %v2679_v37 = vpack.c.bf16 %v1229_v34, %v1227_v33  ;;  %v2715_v33 = vpack.c.bf16 %v1362_v30, %v1360_v29  ;;  %v1507_v5 = vld [vmem:[%s3837_s5 + $0x60] sm:$0xff] }
 0x185   :  { %v1867_v14 = vld [vmem:[%s3839_s7] sm:$0xff] }
 0x186   :  { %2644 = vmatpush1.bf16.msra.mxu1 %v2643_v39  ;;  %v1231_v39 = vld [vmem:[#allocation2 + $0x320] sm:$0xff] }
 0x187   :  { %2646 = vmatprep.subr.bf16.mxu1 %v2645_v40  ;;  %v1233_v40 = vld [vmem:[#allocation2 + $0x330] sm:$0xff]  ;;  %v1871_v22 = vld [vmem:[%s3839_s7 + $0x20] sm:$0xff] }
 0x188   :  { %v2683_v28 = vpack.c.bf16 %v1233_v40, %v1231_v39  ;;  %v2719_v39 = vpack.c.bf16 %v1366_v36, %v1364_v35  ;;  %v1875_v30 = vld [vmem:[%s3839_s7 + $0x40] sm:$0xff]  ;;  %v1877_v36 = vld [vmem:[%s3839_s7 + $0x50] sm:$0xff] }
 0x189   :  { %1068 = vmatmul.mubr.f32.vlgmr.msra.gmra.mrb[0].mxu1 %v3398_v63  ;;  %v1112_v63 = vld [vmem:[#allocation2 + $0x270] sm:$0xff] }
 0x18a   :  { %2648 = vmatpush1.bf16.msra.mxu1 %v2647_v44  ;;  %1073 = vmatprep.mubr.f32.mxu1 %v3015_v0  ;;  %v2659_v62 = vpack.c.bf16 %v1112_v63, %v1110_v59  ;;  %v1235_v44 = vld [vmem:[#allocation2 + $0x340] sm:$0xff]  ;;  %v1250_v59 = vld [vmem:[#allocation2 + $0x3b8] sm:$0xff] }
 0x18b   :  { %2650 = vmatprep.subr.bf16.mxu1 %v2649_v45  ;;  %v1237_v45 = vld [vmem:[#allocation2 + $0x350] sm:$0xff] }
 0x18c   :  { %v2687_v48 = vpack.c.bf16 %v1237_v45, %v1235_v44  ;;  %v1372_v45 = vld [vmem:[#allocation2 + $0x480] sm:$0xff] }
 0x18d   :  { %1074 = vmatmul.mubr.f32.gmra.mrb[2].mxu1 %v3432_v52  ;;  %v2663_v52 = vpack.c.bf16 %v1116_v3, %v1114_v2  ;;  %v2699_v2 = vpack.c.bf16 %v1249_v61, %v1247_v60  ;;  %v1384_v60 = vld [vmem:[#allocation2 + $0x4e0] sm:$0xff]  ;;  %v1386_v61 = vld [vmem:[#allocation2 + $0x4f0] sm:$0xff] }
 0x18e   :  { %2652 = vmatpush1.bf16.msra.mxu1 %v2651_v50  ;;  %1194 = vmatprep.mubr.f32.mxu1 %v3015_v0  ;;  %v1239_v50 = vld [vmem:[#allocation2 + $0x360] sm:$0xff] }
 0x18f   :  { %2654 = vmatprep.subr.bf16.mxu1 %v2653_v51  ;;  %v1244_v51 = vld [vmem:[#allocation2 + $0x388] sm:$0xff] }
 0x190   :  { %v2693_v55 = vpack.c.bf16 %v1246_v53, %v1244_v51  ;;  %v1381_v51 = vld [vmem:[#allocation2 + $0x4c8] sm:$0xff]  ;;  %v1383_v53 = vld [vmem:[#allocation2 + $0x4d8] sm:$0xff] }
 0x192   :  { %2656 = vmatpush1.bf16.msra.mxu1 %v2655_v57  ;;  %v1245_v57 = vld [vmem:[#allocation2 + $0x390] sm:$0xff] }
 0x193   :  { %2658 = vmatprep.subr.bf16.mxu1 %v2657_v58  ;;  %v1248_v58 = vld [vmem:[#allocation2 + $0x3a8] sm:$0xff] }
 0x194   :  { %v2697_v63 = vpack.c.bf16 %v1250_v59, %v1248_v58  ;;  %v1385_v58 = vld [vmem:[#allocation2 + $0x4e8] sm:$0xff]  ;;  %v1387_v59 = vld [vmem:[#allocation2 + $0x4f8] sm:$0xff] }
 0x196   :  { %2660 = vmatpush1.bf16.msra.mxu1 %v2659_v62  ;;  %v1252_v62 = vld [vmem:[#allocation2 + $0x3c8] sm:$0xff] }
 0x197   :  { %2662 = vmatprep.subr.bf16.mxu1 %v2661_v1  ;;  %v1254_v1 = vld [vmem:[#allocation2 + $0x3d8] sm:$0xff] }
 0x198   :  { %v2701_v3 = vpack.c.bf16 %v1254_v1, %v1252_v62  ;;  %v2739_v62 = vpack.c.bf16 %v1386_v61, %v1384_v60  ;;  %v1503_v1 = vld [vmem:[%s3837_s5 + $0x40] sm:$0xff]  ;;  %v2172_v60 = vld [vmem:[%s3837_s5 + $0x98] sm:$0xff] }
 0x19a   :  { %2664 = vmatpush1.bf16.msra.mxu1 %v2663_v52  ;;  %v1256_v52 = vld [vmem:[#allocation2 + $0x3e8] sm:$0xff] }
 0x19b   :  { %2666 = vmatprep.subr.bf16.mxu1 %v2665_v6  ;;  %v1258_v6 = vld [vmem:[#allocation2 + $0x3f8] sm:$0xff] }
 0x19c   :  { %v2705_v9 = vpack.c.bf16 %v1258_v6, %v1256_v52  ;;  %v1508_v52 = vld [vmem:[%s3837_s5 + $0x68] sm:$0xff] }
 0x19d   :  { %v2760_v6 = vpack.c.bf16 %v1508_v52, %v1507_v5  ;;  %v2176_v5 = vld [vmem:[%s3837_s5 + $0xb8] sm:$0xff] }
 0x19e   :  { %2668 = vmatpush1.bf16.msra.mxu1 %v2667_v15  ;;  %v1357_v15 = vld [vmem:[#allocation2 + $0x408] sm:$0xff] }
 0x19f   :  { %2670 = vmatprep.subr.bf16.mxu1 %v2669_v16  ;;  %v1359_v16 = vld [vmem:[#allocation2 + $0x418] sm:$0xff] }
 0x1a0   :  { %v2709_v20 = vpack.c.bf16 %v1359_v16, %v1357_v15  ;;  %v1868_v15 = vld [vmem:[%s3839_s7 + $0x8] sm:$0xff]  ;;  %v1869_v16 = vld [vmem:[%s3839_s7 + $0x10] sm:$0xff] }
 0x1a2   :  { %2672 = vmatpush1.bf16.msra.mxu1 %v2671_v23  ;;  %v1361_v23 = vld [vmem:[#allocation2 + $0x428] sm:$0xff] }
 0x1a3   :  { %2674 = vmatprep.subr.bf16.mxu1 %v2673_v25  ;;  %v1363_v25 = vld [vmem:[#allocation2 + $0x438] sm:$0xff] }
 0x1a4   :  { %v2713_v27 = vpack.c.bf16 %v1363_v25, %v1361_v23  ;;  %v1872_v23 = vld [vmem:[%s3839_s7 + $0x28] sm:$0xff] }
 0x1a5   :  { %v2844_v25 = vpack.c.bf16 %v1872_v23, %v1871_v22  ;;  %v2184_v22 = vld [vmem:[%s3837_s5 + $0xf8] sm:$0xff] }
 0x1a6   :  { %2676 = vmatpush1.bf16.msra.mxu1 %v2675_v31  ;;  %v1365_v31 = vld [vmem:[#allocation2 + $0x448] sm:$0xff] }
 0x1a7   :  { %2678 = vmatprep.subr.bf16.mxu1 %v2677_v32  ;;  %v1367_v32 = vld [vmem:[#allocation2 + $0x458] sm:$0xff] }
 0x1a8   :  { %v2717_v34 = vpack.c.bf16 %v1367_v32, %v1365_v31  ;;  %v1876_v31 = vld [vmem:[%s3839_s7 + $0x48] sm:$0xff] }
 0x1a9   :  { %1195 = vmatmul.mubr.f32.vlgmr.msra.gmra.mrb[0].mxu1 %v3405_v17  ;;  %v1241_v17 = vld [vmem:[#allocation2 + $0x370] sm:$0xff]  ;;  %v2850_v35 = vpack.c.bf16 %v1876_v31, %v1875_v30  ;;  %v2188_v30 = vld [vmem:[%s3837_s5 + $0x118] sm:$0xff] }
 0x1aa   :  { %2680 = vmatpush1.bf16.msra.mxu1 %v2679_v37  ;;  %1200 = vmatprep.mubr.f32.mxu1 %v3015_v0  ;;  %v2691_v54 = vpack.c.bf16 %v1241_v17, %v1239_v50  ;;  %v1369_v37 = vld [vmem:[#allocation2 + $0x468] sm:$0xff]  ;;  %v1376_v50 = vld [vmem:[#allocation2 + $0x4a0] sm:$0xff]  ;;  %v1378_v17 = vld [vmem:[#allocation2 + $0x4b0] sm:$0xff] }
 0x1ab   :  { %2682 = vmatprep.subr.bf16.mxu1 %v2681_v38  ;;  %v1371_v38 = vld [vmem:[#allocation2 + $0x478] sm:$0xff] }
 0x1ac   :  { %v2721_v40 = vpack.c.bf16 %v1371_v38, %v1369_v37  ;;  %v1878_v37 = vld [vmem:[%s3839_s7 + $0x58] sm:$0xff] }
 0x1ad   :  { %1201 = vmatmul.mubr.f32.gmra.mrb[2].mxu1 %v3444_v7  ;;  %v2695_v7 = vpack.c.bf16 %v1245_v57, %v1243_v56  ;;  %v1380_v56 = vld [vmem:[#allocation2 + $0x4c0] sm:$0xff]  ;;  %v1382_v57 = vld [vmem:[#allocation2 + $0x4d0] sm:$0xff] }
 0x1ae   :  { %2684 = vmatpush1.bf16.msra.mxu1 %v2683_v28  ;;  %1323 = vmatprep.mubr.f32.mxu1 %v3015_v0  ;;  %v1375_v28 = vld [vmem:[#allocation2 + $0x498] sm:$0xff] }
 0x1af   :  { %2686 = vmatprep.subr.bf16.mxu1 %v2685_v43  ;;  %v2725_v44 = vpack.c.bf16 %v1375_v28, %v1373_v41  ;;  %v2853_v28 = vpack.c.bf16 %v1878_v37, %v1877_v36  ;;  %v2192_v36 = vld [vmem:[%s3837_s5 + $0x138] sm:$0xff] }
 0x1b2   :  { %2688 = vmatpush1.bf16.msra.mxu1 %v2687_v48  ;;  %v1379_v48 = vld [vmem:[#allocation2 + $0x4b8] sm:$0xff] }
 0x1b3   :  { %2690 = vmatprep.subr.bf16.mxu1 %v2689_v49  ;;  %v2729_v49 = vpack.c.bf16 %v1379_v48, %v1377_v47 }
 0x1b6   :  { %2692 = vmatpush1.bf16.msra.mxu1 %v2691_v54  ;;  %v2731_v54 = vpack.c.bf16 %v1378_v17, %v1376_v50  ;;  %v2169_v50 = vld [vmem:[%s3837_s5 + $0x80] sm:$0xff]  ;;  %v2170_v17 = vld [vmem:[%s3837_s5 + $0x88] sm:$0xff] }
 0x1b7   :  { %2694 = vmatprep.subr.bf16.mxu1 %v2693_v55  ;;  %v2733_v55 = vpack.c.bf16 %v1383_v53, %v1381_v51 }
 0x1ba   :  { %2696 = vmatpush1.bf16.msra.mxu1 %v2695_v7  ;;  %v2735_v7 = vpack.c.bf16 %v1382_v57, %v1380_v56 }
 0x1bb   :  { %2698 = vmatprep.subr.bf16.mxu1 %v2697_v63  ;;  %v2737_v63 = vpack.c.bf16 %v1387_v59, %v1385_v58 }
 0x1be   :  { %2700 = vmatpush1.bf16.msra.mxu1 %v2699_v2  ;;  %v1504_v2 = vld [vmem:[%s3837_s5 + $0x48] sm:$0xff] }
 0x1bf   :  { %2702 = vmatprep.subr.bf16.mxu1 %v2701_v3  ;;  %v2754_v3 = vpack.c.bf16 %v1504_v2, %v1503_v1 }
 0x1c1   :  { %2755 = vmatpush3.bf16.msra.mxu0 %v2754_v3  ;;  %v2173_v3 = vld [vmem:[%s3837_s5 + $0xa0] sm:$0xff] }
 0x1c2   :  { %2704 = vmatpush1.bf16.msra.mxu1 %v2703_v8  ;;  %2756 = vmatprep.subr.bf16.mxu0 %v3017_v42  ;;  %v1509_v8 = vld [vmem:[%s3837_s5 + $0x70] sm:$0xff] }
 0x1c3   :  { %2706 = vmatprep.subr.bf16.mxu1 %v2705_v9  ;;  %v1510_v9 = vld [vmem:[%s3837_s5 + $0x78] sm:$0xff] }
 0x1c4   :  { %v2763_v13 = vpack.c.bf16 %v1510_v9, %v1509_v8  ;;  %v2178_v8 = vld [vmem:[%s3837_s5 + $0xc8] sm:$0xff] }
 0x1c6   :  { %2708 = vmatpush1.bf16.msra.mxu1 %v2707_v19  ;;  %v2838_v19 = vpack.c.bf16 %v1868_v15, %v1867_v14  ;;  %v2180_v14 = vld [vmem:[%s3837_s5 + $0xd8] sm:$0xff] }
 0x1c7   :  { %2710 = vmatprep.subr.bf16.mxu1 %v2709_v20  ;;  %v1870_v20 = vld [vmem:[%s3839_s7 + $0x18] sm:$0xff] }
 0x1c8   :  { %v2841_v21 = vpack.c.bf16 %v1870_v20, %v1869_v16  ;;  %v2181_v16 = vld [vmem:[%s3837_s5 + $0xe0] sm:$0xff] }
 0x1c9   :  { %1324 = vmatmul.mubr.f32.vlgmr.msra.gmra.mrb[0].mxu1 %v3408_v18  ;;  %v1370_v18 = vld [vmem:[#allocation2 + $0x470] sm:$0xff] }
 0x1ca   :  { %2712 = vmatpush1.bf16.msra.mxu1 %v2711_v26  ;;  %1329 = vmatprep.mubr.f32.mxu1 %v3015_v0  ;;  %v2723_v43 = vpack.c.bf16 %v1370_v18, %v1368_v10  ;;  %v1873_v26 = vld [vmem:[%s3839_s7 + $0x30] sm:$0xff] }
 0x1cb   :  { %2714 = vmatprep.subr.bf16.mxu1 %v2713_v27  ;;  %v1874_v27 = vld [vmem:[%s3839_s7 + $0x38] sm:$0xff] }
 0x1cc   :  { %v2847_v29 = vpack.c.bf16 %v1874_v27, %v1873_v26  ;;  %v2186_v26 = vld [vmem:[%s3837_s5 + $0x108] sm:$0xff] }
 0x1cd   :  { %1330 = vmatmul.mubr.f32.gmra.mrb[2].mxu1 %v3450_v11  ;;  %v2727_v11 = vpack.c.bf16 %v1374_v46, %v1372_v45 }
 0x1ce   :  { %2716 = vmatpush1.bf16.msra.mxu1 %v2715_v33  ;;  %1452 = vmatprep.mubr.f32.mxu1 %v3015_v0 }
 0x1cf   :  { %2718 = vmatprep.subr.bf16.mxu1 %v2717_v34 }
 0x1d2   :  { %2720 = vmatpush1.bf16.msra.mxu1 %v2719_v39 }
 0x1d3   :  { %2722 = vmatprep.subr.bf16.mxu1 %v2721_v40  ;;  %v2167_v40 = vld [vmem:[%s3836_s4] ss:$0 sm:$0xff] }
 0x1d6   :  { %2724 = vmatpush1.bf16.msra.mxu1 %v2723_v43  ;;  %v1879_v43 = vld [vmem:[%s3839_s7 + $0x60] sm:$0xff] }
 0x1d7   :  { %2726 = vmatprep.subr.bf16.mxu1 %v2725_v44  ;;  %v1880_v44 = vld [vmem:[%s3839_s7 + $0x68] sm:$0xff] }
 0x1da   :  { %2728 = vmatpush1.bf16.msra.mxu1 %v2727_v11  ;;  %v2856_v11 = vpack.c.bf16 %v1880_v44, %v1879_v43  ;;  %v2198_v43 = vld [vmem:[%s3837_s5 + $0x168] sm:$0xff] }
 0x1db   :  { %2730 = vmatprep.subr.bf16.mxu1 %v2729_v49 }
 0x1de   :  { %2732 = vmatpush1.bf16.msra.mxu1 %v2731_v54  ;;  %v2766_v54 = vpack.c.bf16 %v2170_v17, %v2169_v50  ;;  %v2203_v50 = vld [vmem:[%s3837_s5 + $0x190] sm:$0xff]  ;;  %v2204_v17 = vld [vmem:[%s3837_s5 + $0x198] sm:$0xff] }
 0x1df   :  { %2734 = vmatprep.subr.bf16.mxu1 %v2733_v55 }
 0x1e2   :  { %2736 = vmatpush1.bf16.msra.mxu1 %v2735_v7 }
 0x1e3   :  { %2738 = vmatprep.subr.bf16.mxu1 %v2737_v63  ;;  %v2171_v63 = vld [vmem:[%s3837_s5 + $0x90] sm:$0xff] }
 0x1e4   :  { %v2769_v2 = vpack.c.bf16 %v2172_v60, %v2171_v63  ;;  %v2211_v60 = vld [vmem:[%s3837_s5 + $0x1d0] sm:$0xff] }
 0x1e6   :  { %2740 = vmatpush1.bf16.msra.mxu1 %v2739_v62 }
 0x1e7   :  { %2837 = vmatprep.subr.bf16.mxu1 %v3017_v42 }
 0x1e9   :  { %1453 = vmatmul.mubr.f32.vlgmr.msra.gmra.mrb[0].mxu1 %v3414_v24  ;;  %v1505_v24 = vld [vmem:[%s3837_s5 + $0x50] sm:$0xff] }
 0x1ea   :  { %1458 = vmatprep.mubr.f32.mxu1 %v3015_v0  ;;  %2839 = vmatpush3.bf16.msra.mxu1 %v2838_v19  ;;  %v2182_v19 = vld [vmem:[%s3837_s5 + $0xe8] sm:$0xff] }
 0x1eb   :  { %2840 = vmatprep.subr.bf16.mxu1 %v3017_v42  ;;  %v2784_v20 = vpack.c.bf16 %v2182_v19, %v2181_v16 }
 0x1ed   :  { %1459 = vmatmul.mubr.f32.gmra.mrb[2].mxu1 %v3453_v12  ;;  %v1506_v12 = vld [vmem:[%s3837_s5 + $0x58] sm:$0xff] }
 0x1ee   :  { %v2757_v4 = vpack.c.bf16 %v1506_v12, %v1505_v24  ;;  %2493 = vmatprep.mubr.msk.f32.mxu1 %vm3018_vm8, %v3015_v0  ;;  %2842 = vmatpush3.bf16.msra.mxu1 %v2841_v21  ;;  %v2174_v24 = vld [vmem:[%s3837_s5 + $0xa8] sm:$0xff]  ;;  %v2183_v21 = vld [vmem:[%s3837_s5 + $0xf0] sm:$0xff] }
 0x1ef   :  { %2843 = vmatprep.subr.bf16.mxu1 %v3017_v42  ;;  %v2772_v12 = vpack.c.bf16 %v2174_v24, %v2173_v3  ;;  %v2787_v23 = vpack.c.bf16 %v2184_v22, %v2183_v21  ;;  %v2214_v3 = vld [vmem:[%s3837_s5 + $0x1e8] sm:$0xff]  ;;  %v1963_v21 = vld [vmem:[%s3841_s9 + $0x10] sm:$0xff]  ;;  %v1964_v22 = vld [vmem:[%s3841_s9 + $0x18] sm:$0xff] }
 0x1f0   :  { %2758 = vmatpush3.bf16.msra.mxu0 %v2757_v4  ;;  %v2175_v4 = vld [vmem:[%s3837_s5 + $0xb0] sm:$0xff] }
 0x1f1   :  { %2759 = vmatprep.subr.bf16.mxu0 %v3017_v42  ;;  %v2775_v52 = vpack.c.bf16 %v2176_v5, %v2175_v4  ;;  %v2216_v4 = vld [vmem:[%s3837_s5 + $0x1f8] sm:$0xff] }
 0x1f2   :  { %2845 = vmatpush3.bf16.msra.mxu1 %v2844_v25  ;;  %v2185_v25 = vld [vmem:[%s3837_s5 + $0x100] sm:$0xff] }
 0x1f3   :  { %2846 = vmatprep.subr.bf16.mxu1 %v3017_v42  ;;  %v2790_v27 = vpack.c.bf16 %v2186_v26, %v2185_v25  ;;  %v1965_v25 = vld [vmem:[%s3841_s9 + $0x20] sm:$0xff]  ;;  %v1966_v26 = vld [vmem:[%s3841_s9 + $0x28] sm:$0xff] }
 0x1f4   :  { %2761 = vmatpush3.bf16.msra.mxu0 %v2760_v6  ;;  %v2177_v6 = vld [vmem:[%s3837_s5 + $0xc0] sm:$0xff] }
 0x1f5   :  { %2762 = vmatprep.subr.bf16.mxu0 %v3017_v42  ;;  %v2778_v9 = vpack.c.bf16 %v2178_v8, %v2177_v6  ;;  %v1882_v6 = vld [vmem:[%s3839_s7 + $0x78] sm:$0xff] }
 0x1f6   :  { %2848 = vmatpush3.bf16.msra.mxu1 %v2847_v29  ;;  %v2187_v29 = vld [vmem:[%s3837_s5 + $0x110] sm:$0xff] }
 0x1f7   :  { %2849 = vmatprep.subr.bf16.mxu1 %v3017_v42  ;;  %v2793_v31 = vpack.c.bf16 %v2188_v30, %v2187_v29  ;;  %v1967_v29 = vld [vmem:[%s3841_s9 + $0x30] sm:$0xff] }
 0x1f8   :  { %2764 = vmatpush3.bf16.msra.mxu0 %v2763_v13  ;;  %v2179_v13 = vld [vmem:[%s3837_s5 + $0xd0] sm:$0xff] }
 0x1f9   :  { %2765 = vmatprep.subr.bf16.mxu0 %v3017_v42  ;;  %v2781_v15 = vpack.c.bf16 %v2180_v14, %v2179_v13  ;;  %v1962_v13 = vld [vmem:[%s3841_s9 + $0x8] sm:$0xff] }
 0x1fa   :  { %2851 = vmatpush3.bf16.msra.mxu1 %v2850_v35  ;;  %v2191_v35 = vld [vmem:[%s3837_s5 + $0x130] sm:$0xff] }
 0x1fb   :  { %2852 = vmatprep.subr.bf16.mxu1 %v3017_v42  ;;  %v2799_v37 = vpack.c.bf16 %v2192_v36, %v2191_v35  ;;  %v1972_v35 = vld [vmem:[%s3841_s9 + $0x58] sm:$0xff] }
 0x1fe   :  { %2854 = vmatpush3.bf16.msra.mxu1 %v2853_v28  ;;  %v2197_v28 = vld [vmem:[%s3837_s5 + $0x160] sm:$0xff] }
 0x1ff   :  { %2855 = vmatprep.subr.bf16.mxu1 %v3017_v42  ;;  %v2808_v44 = vpack.c.bf16 %v2198_v43, %v2197_v28 }
 0x202   :  { %2857 = vmatpush3.bf16.msra.mxu1 %v2856_v11  ;;  %v2202_v11 = vld [vmem:[%s3837_s5 + $0x188] sm:$0xff] }
 0x203   :  { %2858 = vmatprep.subr.bf16.mxu1 %v3017_v42 }
 0x2bc   :  { %v1454_v32 = vpop.f32.mrb[0].mxu1 }
 0x2bd   :  { %v1456_v33 = vpop.f32.mrb[1].mxu1 }
 0x2be   :  { %v1469_v34 = vmax.f32 %v1454_v32, %v1456_v33  ;;  %v2189_v32 = vld [vmem:[%s3837_s5 + $0x120] sm:$0xff]  ;;  %v2190_v33 = vld [vmem:[%s3837_s5 + $0x128] sm:$0xff] }
 0x2c0   :  { %v1472_v38 = vrot.slane %v1469_v34, 4  ;;  %v1460_v39 = vpop.f32.mrb[2].mxu1 }
 0x2c1   :  { %v1462_v10 = vpop.f32.mrb[3].mxu1 }
 0x2c2   :  { %v1474_v18 = vmax.f32 %v1469_v34, %v1472_v38  ;;  %v1470_v41 = vmax.f32 %v1460_v39, %v1462_v10  ;;  %v2796_v34 = vpack.c.bf16 %v2190_v33, %v2189_v32  ;;  %v2193_v38 = vld [vmem:[%s3837_s5 + $0x140] sm:$0xff]  ;;  %v2194_v39 = vld [vmem:[%s3837_s5 + $0x148] sm:$0xff]  ;;  %v2195_v10 = vld [vmem:[%s3837_s5 + $0x150] sm:$0xff] }
 0x2c3   :  { %v1970_v32 = vld [vmem:[%s3841_s9 + $0x48] sm:$0xff] }
 0x2c4   :  { %v1481_v45 = vadd.f32 %v2167_v40, %v1474_v18  ;;  %v1484_v46 = vrot.slane %v1470_v41, 4  ;;  %v2196_v18 = vld [vmem:[%s3837_s5 + $0x158] sm:$0xff] }
 0x2c6   :  { %v1482_v47 = vmax.f32 %v1481_v45, 0.0  ;;  %v1486_v48 = vmax.f32 %v1470_v41, %v1484_v46  ;;  %v2805_v41 = vpack.c.bf16 %v2196_v18, %v2195_v10  ;;  %v2199_v45 = vld [vmem:[%s3837_s5 + $0x170] sm:$0xff]  ;;  %v2200_v46 = vld [vmem:[%s3837_s5 + $0x178] sm:$0xff] }
 0x2c7   :  { %v1976_v10 = vld [vmem:[%s3841_s9 + $0x78] sm:$0xff] }
 0x2c8   :  { %v1487_v49 = vadd.f32 %v2167_v40, %v1486_v48  ;;  %v1589_v53 = vrot.slane %v1482_v47, 1  ;;  %v1680_v55 = vrot.slane %v1482_v47, 2  ;;  %v1773_v56 = vrot.slane %v1482_v47, 3  ;;  %v2201_v48 = vld [vmem:[%s3837_s5 + $0x180] sm:$0xff] }
 0x2c9   :  { %v2802_v40 = vpack.c.bf16 %v2194_v39, %v2193_v38  ;;  %v1974_v38 = vld [vmem:[%s3841_s9 + $0x68] sm:$0xff] }
 0x2ca   :  { %v1488_v51 = vmax.f32 %v1487_v49, 0.0  ;;  %v2814_v49 = vpack.c.bf16 %v2202_v11, %v2201_v48 }
 0x2cc   :  { %v1491_v57 = vrot.slane %v1488_v51, 7  ;;  %v1591_v58 = vsel %vm1493_vm9, %v1589_v53, %v1488_v51  ;;  %v1682_v59 = vrot.slane %v1488_v51, 1  ;;  %v1775_v7 = vrot.slane %v1488_v51, 2  ;;  %v2205_v53 = vld [vmem:[%s3837_s5 + $0x1a0] sm:$0xff] }
 0x2cd   :  { %v2817_v51 = vpack.c.bf16 %v2204_v17, %v2203_v50 }
 0x2ce   :  { %v1494_v61 = vsel %vm1493_vm9, %v1482_v47, %v1491_v57  ;;  %v3579_v62 = vsel %vm1493_vm9, %v1680_v55, %v1682_v59  ;;  %v3582_v1 = vsel %vm1493_vm9, %v1773_v56, %v1775_v7  ;;  %v2811_v47 = vpack.c.bf16 %v2200_v46, %v2199_v45  ;;  %v2207_v56 = vld [vmem:[%s3837_s5 + $0x1b0] sm:$0xff]  ;;  %v2208_v57 = vld [vmem:[%s3837_s5 + $0x1b8] sm:$0xff]  ;;  %v2209_v59 = vld [vmem:[%s3837_s5 + $0x1c0] sm:$0xff] }
 0x2cf   :  { %2354 = vmatmul.mubr.f32.vlgmr.msra.gmra.mrb[12].mxu0 %v1494_v61  ;;  %v2210_v7 = vld [vmem:[%s3837_s5 + $0x1c8] sm:$0xff]  ;;  %v2212_v61 = vld [vmem:[%s3837_s5 + $0x1d8] sm:$0xff] }
 0x2d0   :  { %2767 = vmatpush3.bf16.msra.mxu0 %v2766_v54  ;;  %2388 = vmatprep.mubr.msk.f32.mxu0 %vm3018_vm8, %v3015_v0  ;;  %v2206_v54 = vld [vmem:[%s3837_s5 + $0x1a8] sm:$0xff]  ;;  %v2826_v63 = vpack.c.bf16 %v2210_v7, %v2209_v59 }
 0x2d1   :  { %2768 = vmatprep.subr.bf16.mxu0 %v3017_v42  ;;  %v2820_v55 = vpack.c.bf16 %v2206_v54, %v2205_v53 }
 0x2d4   :  { %2770 = vmatpush3.bf16.msra.mxu0 %v2769_v2  ;;  %v2213_v2 = vld [vmem:[%s3837_s5 + $0x1e0] sm:$0xff] }
 0x2d5   :  { %2771 = vmatprep.subr.bf16.mxu0 %v3017_v42  ;;  %v2832_v24 = vpack.c.bf16 %v2214_v3, %v2213_v2 }
 0x2d8   :  { %2773 = vmatpush3.bf16.msra.mxu0 %v2772_v12  ;;  %v2215_v12 = vld [vmem:[%s3837_s5 + $0x1f0] sm:$0xff] }
 0x2d9   :  { %2774 = vmatprep.subr.bf16.mxu0 %v3017_v42  ;;  %v2835_v5 = vpack.c.bf16 %v2216_v4, %v2215_v12 }
 0x2dc   :  { %2776 = vmatpush3.bf16.msra.mxu0 %v2775_v52  ;;  %v1881_v52 = vld [vmem:[%s3839_s7 + $0x70] sm:$0xff] }
 0x2dd   :  { %2777 = vmatprep.subr.bf16.mxu0 %v3017_v42  ;;  %v2859_v8 = vpack.c.bf16 %v1882_v6, %v1881_v52 }
 0x2df   :  { %2860 = vmatpush3.bf16.msra.mxu1 %v2859_v8 }
 0x2e0   :  { %2779 = vmatpush3.bf16.msra.mxu0 %v2778_v9  ;;  %2861 = vmatprep.subr.bf16.mxu1 %v3017_v42  ;;  %v2168_v9 = vld [vmem:[%s3838_s6] ss:$0 sm:$0xff] }
 0x2e1   :  { %2780 = vmatprep.subr.bf16.mxu0 %v3017_v42 }
 0x2e4   :  { %2782 = vmatpush3.bf16.msra.mxu0 %v2781_v15 }
 0x2e5   :  { %2783 = vmatprep.subr.bf16.mxu0 %v3017_v42 }
 0x2e8   :  { %2785 = vmatpush3.bf16.msra.mxu0 %v2784_v20 }
 0x2e9   :  { %2786 = vmatprep.subr.bf16.mxu0 %v3017_v42 }
 0x2ec   :  { %2788 = vmatpush3.bf16.msra.mxu0 %v2787_v23  ;;  %v2865_v23 = vpack.c.bf16 %v1964_v22, %v1963_v21 }
 0x2ed   :  { %2789 = vmatprep.subr.bf16.mxu0 %v3017_v42 }
 0x2ef   :  { %2389 = vmatmul.mubr.f32.vlgmr.msra.gmra.mrb[12].mxu0 %v1591_v58  ;;  %v2823_v58 = vpack.c.bf16 %v2208_v57, %v2207_v56 }
 0x2f0   :  { %2791 = vmatpush3.bf16.msra.mxu0 %v2790_v27  ;;  %2423 = vmatprep.mubr.msk.f32.mxu0 %vm3018_vm8, %v3015_v0  ;;  %v2868_v27 = vpack.c.bf16 %v1966_v26, %v1965_v25 }
 0x2f1   :  { %2792 = vmatprep.subr.bf16.mxu0 %v3017_v42 }
 0x2f4   :  { %2794 = vmatpush3.bf16.msra.mxu0 %v2793_v31  ;;  %v1969_v31 = vld [vmem:[%s3841_s9 + $0x40] sm:$0xff] }
 0x2f5   :  { %2795 = vmatprep.subr.bf16.mxu0 %v3017_v42  ;;  %v2874_v33 = vpack.c.bf16 %v1970_v32, %v1969_v31 }
 0x2f8   :  { %2797 = vmatpush3.bf16.msra.mxu0 %v2796_v34  ;;  %v1971_v34 = vld [vmem:[%s3841_s9 + $0x50] sm:$0xff] }
 0x2f9   :  { %2798 = vmatprep.subr.bf16.mxu0 %v3017_v42  ;;  %v2877_v36 = vpack.c.bf16 %v1972_v35, %v1971_v34 }
 0x2fc   :  { %2800 = vmatpush3.bf16.msra.mxu0 %v2799_v37  ;;  %v1973_v37 = vld [vmem:[%s3841_s9 + $0x60] sm:$0xff] }
 0x2fd   :  { %2801 = vmatprep.subr.bf16.mxu0 %v3017_v42  ;;  %v2880_v39 = vpack.c.bf16 %v1974_v38, %v1973_v37 }
 0x300   :  { %2803 = vmatpush3.bf16.msra.mxu0 %v2802_v40  ;;  %v1975_v40 = vld [vmem:[%s3841_s9 + $0x70] sm:$0xff] }
 0x301   :  { %2804 = vmatprep.subr.bf16.mxu0 %v3017_v42  ;;  %v2883_v18 = vpack.c.bf16 %v1976_v10, %v1975_v40 }
 0x304   :  { %2806 = vmatpush3.bf16.msra.mxu0 %v2805_v41  ;;  %v2217_v41 = vld [vmem:[%s3840_s8] ss:$0 sm:$0xff] }
 0x305   :  { %2807 = vmatprep.subr.bf16.mxu0 %v3017_v42 }
 0x308   :  { %2809 = vmatpush3.bf16.msra.mxu0 %v2808_v44 }
 0x309   :  { %2810 = vmatprep.subr.bf16.mxu0 %v3017_v42 }
 0x30c   :  { %2812 = vmatpush3.bf16.msra.mxu0 %v2811_v47 }
 0x30d   :  { %2813 = vmatprep.subr.bf16.mxu0 %v3017_v42 }
 0x30f   :  { %2424 = vmatmul.mubr.f32.vlgmr.msra.gmra.mrb[12].mxu0 %v3579_v62  ;;  %v2829_v62 = vpack.c.bf16 %v2212_v61, %v2211_v60 }
 0x310   :  { %2815 = vmatpush3.bf16.msra.mxu0 %v2814_v49  ;;  %2458 = vmatprep.mubr.msk.f32.mxu0 %vm3018_vm8, %v3015_v0 }
 0x311   :  { %2816 = vmatprep.subr.bf16.mxu0 %v3017_v42 }
 0x314   :  { %2818 = vmatpush3.bf16.msra.mxu0 %v2817_v51 }
 0x315   :  { %2819 = vmatprep.subr.bf16.mxu0 %v3017_v42 }
 0x318   :  { %2821 = vmatpush3.bf16.msra.mxu0 %v2820_v55 }
 0x319   :  { %2822 = vmatprep.subr.bf16.mxu0 %v3017_v42 }
 0x31c   :  { %2824 = vmatpush3.bf16.msra.mxu0 %v2823_v58 }
 0x31d   :  { %2825 = vmatprep.subr.bf16.mxu0 %v3017_v42 }
 0x320   :  { %2827 = vmatpush3.bf16.msra.mxu0 %v2826_v63 }
 0x321   :  { %2828 = vmatprep.subr.bf16.mxu0 %v3017_v42 }
 0x324   :  { %2830 = vmatpush3.bf16.msra.mxu0 %v2829_v62 }
 0x325   :  { %2831 = vmatprep.subr.bf16.mxu0 %v3017_v42 }
 0x328   :  { %2833 = vmatpush3.bf16.msra.mxu0 %v2832_v24 }
 0x329   :  { %2834 = vmatprep.subr.bf16.mxu0 %v3017_v42 }
 0x32c   :  { %2836 = vmatpush3.bf16.msra.mxu0 %v2835_v5 }
 0x32f   :  { %2459 = vmatmul.mubr.f32.vlgmr.msra.gmra.mrb[12].mxu0 %v3582_v1  ;;  %v1961_v1 = vld [vmem:[%s3841_s9] sm:$0xff] }
 0x330   :  { %v2862_v19 = vpack.c.bf16 %v1962_v13, %v1961_v1 }
 0x402   :  { %v1861_v14 = vpop.f32.mrb[12].mxu0 }
 0x403   :  { %v2885_v15 = vadd.f32 %v2168_v9, %v1861_v14  ;;  %v2460_v16 = vpop.f32.mrb[13].mxu0 }
 0x405   :  { %v1866_v20 = vmax.f32 %v2885_v15, 0.0 }
 0x407   :  { %2494 = vmatmul.mubr.f32.vlgmr.msra.gmra.mrb[4].mxu1 %v1866_v20 }
 0x408   :  { %2863 = vmatpush3.bf16.msra.mxu1 %v2862_v19  ;;  %2528 = vmatprep.mubr.msk.f32.mxu1 %vm3018_vm8, %v3015_v0  ;;  %v1968_v0 = vld [vmem:[%s3841_s9 + $0x38] sm:$0xff]  ;;  %s2986_s9 = scalar_lea.vmem %s2062_s15, 32 }
 0x409   :  { %2864 = vmatprep.subr.bf16.mxu1 %v3017_v42  ;;  %v2871_v30 = vpack.c.bf16 %v1968_v0, %v1967_v29  ;;  %p2987_p8 = scmp.ne.s32.totalorder %s2062_s15, %s2986_s9  ;;  %p2992_p10 = scmp.lt.s32.totalorder %s2986_s9, %s2986_s9 }
 0x40b   :  { %p2993_p11 = por %p2992_p10, %p2991_p9 }
 0x40c   :  { %2866 = vmatpush3.bf16.msra.mxu1 %v2865_v23 }
 0x40d   :  { %2867 = vmatprep.subr.bf16.mxu1 %v3017_v42  ;;  %p2994_p12 = pnand %p2993_p11, %p2987_p8 }
 0x410   :  { %2869 = vmatpush3.bf16.msra.mxu1 %v2868_v27 }
 0x411   :  { %2870 = vmatprep.subr.bf16.mxu1 %v3017_v42 }
 0x414   :  { %2872 = vmatpush3.bf16.msra.mxu1 %v2871_v30 }
 0x415   :  { %2873 = vmatprep.subr.bf16.mxu1 %v3017_v42 }
 0x418   :  { %2875 = vmatpush3.bf16.msra.mxu1 %v2874_v33 }
 0x419   :  { %2876 = vmatprep.subr.bf16.mxu1 %v3017_v42 }
 0x41c   :  { %2878 = vmatpush3.bf16.msra.mxu1 %v2877_v36 }
 0x41d   :  { %2879 = vmatprep.subr.bf16.mxu1 %v3017_v42 }
 0x420   :  { %2881 = vmatpush3.bf16.msra.mxu1 %v2880_v39 }
 0x421   :  { %2882 = vmatprep.subr.bf16.mxu1 %v3017_v42  ;;  %v2218_v42 = vld [vmem:[%s3842_s10] ss:$0 sm:$0xff] }
 0x424   :  { %2884 = vmatpush3.bf16.msra.mxu1 %v2883_v18 }
 0x4da   :  { %v1956_v28 = vpop.f32.mrb[4].mxu1 }
 0x4db   :  { %v1957_v43 = vadd.f32 %v2217_v41, %v1956_v28  ;;  %v2495_v44 = vpop.f32.mrb[5].mxu1 }
 0x4dd   :  { %v1960_v45 = vmax.f32 %v1957_v43, 0.0 }
 0x4df   :  { %2529 = vmatmul.mubr.f32.vlgmr.msra.gmra.mrb[6].mxu1 %v1960_v45 }
 0x5b2   :  { %v2050_v46 = vpop.f32.mrb[6].mxu1 }
 0x5b3   :  { %v2051_v47 = vadd.f32 %v2218_v42, %v2050_v46  ;;  %v2530_v48 = vpop.f32.mrb[7].mxu1 }
 0x5b5   :  { %2054 = vst [vmem:[#allocation5] sm:$0x3] %v2051_v47 }
 0x5b6   :  { %2997 = shalt.err (!%p2994_p12)
}
 0x5b7   :  { %s2998_s17 = scalar_lea.hbm %s3843_s11, 32 }
 0x5b8   :  { %p2999_p13 = scmp.ne.s32.totalorder %s3843_s11, %s2998_s17  ;;  %p3002_p0 = scmp.lt.u32.totalorder %s2998_s17, %s3843_s11 }
 0x5ba   :  { %p3004_p1 = pnand %p3002_p0, %p2999_p13 }
 0x5bc   :  { %3007 = shalt.err (!%p3004_p1)
}
 0x5bd   :  { %2064 = dma.vmem_to_hbm [thread:$0]  %s2062_s15, 32, %s3843_s11, [#allocation4]  }
 0x5be   :  { %3010 = dma.done.wait [#allocation4], 32  }
 0x5bf   :  { %3011 = vsyncadd [#allocation4], 4294967264 }
 0x5c0   :  { %2068 = vsyncpa [#allocation3], 1 }
 0x5c1   :  { %2069 = vsyncpa [#allocation4], 1 }

</bundles_post_ra>
